<compile_context>
chip_gen: v5e
topology: v5e:2x2
jax: 0.10.0
libtpu: 0.0.40
codegen_flags: <defaults>
</compile_context>

<pallas_src>
import functools

import jax
import jax.numpy as jnp
from jax.experimental import pallas as pl
from jax.experimental.pallas import tpu as pltpu

INPUT_SIZE = 7 * 10        # 70
HIDDEN_SIZE = 300
OUTPUT_SIZE = 59 * 77      # 4543


def _round_up(n, m):
    return ((n + m - 1) // m) * m


def _pad2d(a, rows, cols):
    return jnp.pad(a, ((0, rows - a.shape[0]), (0, cols - a.shape[1])))


def _resident_spec(shape):
    """BlockSpec for an operand whose block index is constant across the grid.

    Single-buffer it (the data never changes), reclaiming VMEM the default
    2-deep pipeline would spend on a duplicate copy.  Falls back to the
    default spec if this JAX version does not expose pipeline_mode/Buffered.
    """
    index_map = lambda i, j: (0, 0)
    try:
        return pl.BlockSpec(shape, index_map, pipeline_mode=pl.Buffered(1))
    except (TypeError, AttributeError):
        return pl.BlockSpec(shape, index_map)


def prepare_params(w1, b1, w2, b2, w3, b3, *, param_dtype=jnp.bfloat16, tn=512):
    """Pad (128-lane multiples) + cast the parameters ONCE at model-load time.

    Weights are in (in, out) layout (transpose of torch's (out, in)).
    Returns padded arrays to be passed straight into `downscaling_forward`.
    """
    assert tn % 128 == 0
    in_dim, h1 = w1.shape
    _, h2 = w2.shape
    _, out_dim = w3.shape

    in_p = _round_up(in_dim, 128)    # 70   -> 128
    h1_p = _round_up(h1, 128)        # 300  -> 384
    h2_p = _round_up(h2, 128)        # 300  -> 384
    out_p = _round_up(out_dim, tn)   # 4543 -> 4608 (tn=512)

    wd = param_dtype if param_dtype is not None else w1.dtype
    w1p = _pad2d(w1, in_p, h1_p).astype(wd)
    w2p = _pad2d(w2, h1_p, h2_p).astype(wd)
    w3p = _pad2d(w3, h2_p, out_p).astype(wd)
    # Biases stay f32 (added onto the f32 MXU accumulator).
    b1p = _pad2d(jnp.asarray(b1).reshape(1, -1), 1, h1_p).astype(jnp.float32)
    b2p = _pad2d(jnp.asarray(b2).reshape(1, -1), 1, h2_p).astype(jnp.float32)
    b3p = _pad2d(jnp.asarray(b3).reshape(1, -1), 1, out_p).astype(jnp.float32)
    return (w1p, b1p, w2p, b2p, w3p, b3p)


def _mlp_kernel(x_ref, w1_ref, b1_ref, w2_ref, b2_ref, w3_ref, b3_ref,
                o_ref, h2_ref):
    """Fused MLP.  Grid = (batch tiles, output/N tiles); N is innermost.

    At j == 0 the first two layers are computed once per batch tile into the
    VMEM scratch `h2_ref`; every N tile then runs one (block_b, h2_p) x
    (h2_p, tn) MXU matmul against the streamed W3 tile.
    """
    @pl.when(pl.program_id(1) == 0)
    def _():
        x = x_ref[...]
        h1 = jnp.dot(x, w1_ref[...], preferred_element_type=jnp.float32) + b1_ref[...]
        h1 = jnp.maximum(h1, 0.0)          # ReLU
        # dropout (eval mode) == identity
        h1 = h1.astype(w2_ref.dtype)
        h2 = jnp.dot(h1, w2_ref[...], preferred_element_type=jnp.float32) + b2_ref[...]
        h2 = jnp.maximum(h2, 0.0)          # ReLU
        # dropout (eval mode) == identity
        h2_ref[...] = h2.astype(h2_ref.dtype)

    out = jnp.dot(h2_ref[...], w3_ref[...],
                  preferred_element_type=jnp.float32) + b3_ref[...]
    o_ref[...] = out.astype(o_ref.dtype)


@functools.partial(jax.jit,
                   static_argnames=("out_dim", "block_b_max", "tn", "trim_output"))
def downscaling_forward(x, w1p, b1p, w2p, b2p, w3p, b3p, *, out_dim,
                        block_b_max=256, tn=512, trim_output=True):
    """Forward pass of DownscalingModel (eval mode).

    x: (B, 70).  w*/b* must come from `prepare_params` (already padded/cast).
    block_b_max: batch-tile cap (256 for v6e/v7x; 128 recommended on v5e).
    trim_output: slice off lane/batch padding; set False to keep the padded
                 (B, out_p) layout and skip the post-kernel copy.
    """
    B, _ = x.shape
    in_p, h1_p = w1p.shape
    h2_p = w2p.shape[1]
    out_p = w3p.shape[1]
    assert out_p % tn == 0 and tn % 128 == 0, "tn must divide padded output dim"

    out_dtype = x.dtype
    wd = w1p.dtype
    # Sublane granule for the activation dtype: 8 rows (f32) / 16 rows (bf16).
    granule = 8 * (4 // jnp.dtype(wd).itemsize)
    block_b = min(block_b_max, _round_up(B, granule))
    b_p = _round_up(B, block_b)

    xp = _pad2d(x, b_p, in_p).astype(wd)

    grid = (b_p // block_b, out_p // tn)

    out_padded = pl.pallas_call(
        _mlp_kernel,
        out_shape=jax.ShapeDtypeStruct((b_p, out_p), out_dtype),
        grid_spec=pltpu.PrefetchScalarGridSpec(
            num_scalar_prefetch=0,
            grid=grid,
            in_specs=[
                pl.BlockSpec((block_b, in_p), lambda i, j: (i, 0)),  # x tile
                _resident_spec((in_p, h1_p)),                        # W1 (resident)
                _resident_spec((1, h1_p)),                           # b1
                _resident_spec((h1_p, h2_p)),                        # W2 (resident)
                _resident_spec((1, h2_p)),                           # b2
                pl.BlockSpec((h2_p, tn), lambda i, j: (0, j)),       # W3 tile (2-buffered stream)
                pl.BlockSpec((1, tn), lambda i, j: (0, j)),          # b3 tile
            ],
            out_specs=pl.BlockSpec((block_b, tn), lambda i, j: (i, j)),
            scratch_shapes=[pltpu.VMEM((block_b, h2_p), wd)],        # h2 reuse
        ),
        compiler_params=pltpu.CompilerParams(
            # Batch axis is independent (parallel); N axis carries the h2
            # scratch (pl.when(j == 0)), so it must stay "arbitrary".
            dimension_semantics=("parallel", "arbitrary"),
        ),
    )(xp, w1p, b1p, w2p, b2p, w3p, b3p)

    if trim_output:
        return out_padded[:B, :out_dim]
    return out_padded[:B]


def xavier_uniform(key, fan_in, fan_out, dtype=jnp.float32):
    """Matches torch.nn.init.xavier_uniform_ (gain=1), sampled in (in, out) layout."""
    limit = jnp.sqrt(6.0 / (fan_in + fan_out))
    return jax.random.uniform(key, (fan_in, fan_out), dtype, -limit, limit)


def reference_forward(x, w1, b1, w2, b2, w3, b3):
    h1 = jnp.maximum(x @ w1 + b1, 0.0)
    h2 = jnp.maximum(h1 @ w2 + b2, 0.0)
    return h2 @ w3 + b3


if __name__ == "__main__":
    key = jax.random.PRNGKey(0)
    k_x, k1, k2, k3 = jax.random.split(key, 4)

    batch = 8
    x = jax.random.normal(k_x, (batch, INPUT_SIZE), jnp.float32)

    # Deterministic xavier-uniform weights, zero biases (as in init_weights()).
    w1 = xavier_uniform(k1, INPUT_SIZE, HIDDEN_SIZE)
    w2 = xavier_uniform(k2, HIDDEN_SIZE, HIDDEN_SIZE)
    w3 = xavier_uniform(k3, HIDDEN_SIZE, OUTPUT_SIZE)
    b1 = jnp.zeros((HIDDEN_SIZE,), jnp.float32)
    b2 = jnp.zeros((HIDDEN_SIZE,), jnp.float32)
    b3 = jnp.zeros((OUTPUT_SIZE,), jnp.float32)

    ref = reference_forward(x, w1, b1, w2, b2, w3, b3)

    # --- f32 path: tight correctness check against the f32 reference. ---
    params_f32 = prepare_params(w1, b1, w2, b2, w3, b3, param_dtype=None)
    out_f32 = downscaling_forward(x, *params_f32, out_dim=OUTPUT_SIZE)
    out_f32 = jax.block_until_ready(out_f32)
    assert out_f32.shape == (batch, OUTPUT_SIZE)
    assert jnp.allclose(out_f32, ref, atol=1e-4, rtol=1e-4), "f32 mismatch vs reference"

    # --- bf16 default path: weights/activations bf16, f32 accumulation. ---
    params_bf16 = prepare_params(w1, b1, w2, b2, w3, b3)  # param_dtype=bf16 default
    out_bf16 = downscaling_forward(x, *params_bf16, out_dim=OUTPUT_SIZE)
    out_bf16 = jax.block_until_ready(out_bf16)
    assert out_bf16.shape == (batch, OUTPUT_SIZE)
    assert jnp.allclose(out_bf16, ref, atol=5e-2, rtol=5e-2), "bf16 mismatch vs reference"

    print("KERNEL_OK")
</pallas_src>

<mosaic_0001>
module attributes {stable_mosaic.version = 11 : i64} {
  func.func @_mlp_kernel(%arg0: i32, %arg1: i32, %arg2: memref<8x128xf32, #tpu.memory_space<vmem>>, %arg3: memref<128x384xf32, #tpu.memory_space<vmem>>, %arg4: memref<1x384xf32, #tpu.memory_space<vmem>>, %arg5: memref<384x384xf32, #tpu.memory_space<vmem>>, %arg6: memref<1x384xf32, #tpu.memory_space<vmem>>, %arg7: memref<384x512xf32, #tpu.memory_space<vmem>>, %arg8: memref<1x512xf32, #tpu.memory_space<vmem>>, %arg9: memref<8x512xf32, #tpu.memory_space<vmem>>, %arg10: memref<8x384xf32, #tpu.memory_space<vmem>>) attributes {dimension_semantics = [#tpu.dimension_semantics<parallel>, #tpu.dimension_semantics<arbitrary>], iteration_bounds = array<i64: 1, 9>, scalar_prefetch = 0 : i64, scratch_operands = 1 : i64, tpu.core_type = #tpu.core_type<tc>, window_params = [{transform_indices = @transform_0, window_bounds = array<i64: 8, 128>}, {pipeline_mode = #tpu.pipeline_mode<synchronous>, transform_indices = @transform_1, window_bounds = array<i64: 128, 384>}, {pipeline_mode = #tpu.pipeline_mode<synchronous>, transform_indices = @transform_2, window_bounds = array<i64: 1, 384>}, {pipeline_mode = #tpu.pipeline_mode<synchronous>, transform_indices = @transform_3, window_bounds = array<i64: 384, 384>}, {pipeline_mode = #tpu.pipeline_mode<synchronous>, transform_indices = @transform_4, window_bounds = array<i64: 1, 384>}, {transform_indices = @transform_5, window_bounds = array<i64: 384, 512>}, {transform_indices = @transform_6, window_bounds = array<i64: 1, 512>}, {transform_indices = @transform_7, window_bounds = array<i64: 8, 512>}]} {
    %c0_i32 = arith.constant 0 : i32
    %0 = arith.cmpi eq, %arg1, %c0_i32 : i32
    %1 = arith.extui %0 : i1 to i32
    %c0_i32_0 = arith.constant 0 : i32
    %2 = arith.cmpi ne, %1, %c0_i32_0 : i32
    scf.if %2 {
      %c0_8 = arith.constant 0 : index
      %c0_9 = arith.constant 0 : index
      %10 = vector.load %arg2[%c0_8, %c0_9] : memref<8x128xf32, #tpu.memory_space<vmem>>, vector<8x128xf32>
      %c0_10 = arith.constant 0 : index
      %c0_11 = arith.constant 0 : index
      %11 = vector.load %arg3[%c0_10, %c0_11] : memref<128x384xf32, #tpu.memory_space<vmem>>, vector<128x384xf32>
      %cst_12 = arith.constant dense<0.000000e+00> : vector<8x384xf32>
      %12 = tpu.matmul %10, %11, %cst_12 {dimension_numbers = #tpu.dot_dimension_numbers<[1], [0], [0], [1], [0, 0, 1, 1], [], []>} : vector<8x128xf32>, vector<128x384xf32>, vector<8x384xf32> -> vector<8x384xf32>
      %c0_13 = arith.constant 0 : index
      %c0_14 = arith.constant 0 : index
      %13 = vector.load %arg4[%c0_13, %c0_14] : memref<1x384xf32, #tpu.memory_space<vmem>>, vector<1x384xf32>
      %14 = vector.broadcast %13 : vector<1x384xf32> to vector<8x384xf32>
      %15 = arith.addf %12, %14 : vector<8x384xf32>
      %cst_15 = arith.constant 0.000000e+00 : f32
      %16 = vector.broadcast %cst_15 : f32 to vector<8x384xf32>
      %17 = arith.maximumf %15, %16 : vector<8x384xf32>
      %c0_16 = arith.constant 0 : index
      %c0_17 = arith.constant 0 : index
      %18 = vector.load %arg5[%c0_16, %c0_17] : memref<384x384xf32, #tpu.memory_space<vmem>>, vector<384x384xf32>
      %cst_18 = arith.constant dense<0.000000e+00> : vector<8x384xf32>
      %19 = tpu.matmul %17, %18, %cst_18 {dimension_numbers = #tpu.dot_dimension_numbers<[1], [0], [0], [1], [0, 0, 1, 1], [], []>} : vector<8x384xf32>, vector<384x384xf32>, vector<8x384xf32> -> vector<8x384xf32>
      %c0_19 = arith.constant 0 : index
      %c0_20 = arith.constant 0 : index
      %20 = vector.load %arg6[%c0_19, %c0_20] : memref<1x384xf32, #tpu.memory_space<vmem>>, vector<1x384xf32>
      %21 = vector.broadcast %20 : vector<1x384xf32> to vector<8x384xf32>
      %22 = arith.addf %19, %21 : vector<8x384xf32>
      %cst_21 = arith.constant 0.000000e+00 : f32
      %23 = vector.broadcast %cst_21 : f32 to vector<8x384xf32>
      %24 = arith.maximumf %22, %23 : vector<8x384xf32>
      %c0_22 = arith.constant 0 : index
      %c0_23 = arith.constant 0 : index
      %25 = vector.load %arg10[%c0_22, %c0_23] : memref<8x384xf32, #tpu.memory_space<vmem>>, vector<8x384xf32>
      tpu.vector_store %arg10[%c0_22, %c0_23], %24 {strides = array<i32>} : memref<8x384xf32, #tpu.memory_space<vmem>>, vector<8x384xf32>,
    } else {
    }
    %c0 = arith.constant 0 : index
    %c0_1 = arith.constant 0 : index
    %3 = vector.load %arg10[%c0, %c0_1] : memref<8x384xf32, #tpu.memory_space<vmem>>, vector<8x384xf32>
    %c0_2 = arith.constant 0 : index
    %c0_3 = arith.constant 0 : index
    %4 = vector.load %arg7[%c0_2, %c0_3] : memref<384x512xf32, #tpu.memory_space<vmem>>, vector<384x512xf32>
    %cst = arith.constant dense<0.000000e+00> : vector<8x512xf32>
    %5 = tpu.matmul %3, %4, %cst {dimension_numbers = #tpu.dot_dimension_numbers<[1], [0], [0], [1], [0, 0, 1, 1], [], []>} : vector<8x384xf32>, vector<384x512xf32>, vector<8x512xf32> -> vector<8x512xf32>
    %c0_4 = arith.constant 0 : index
    %c0_5 = arith.constant 0 : index
    %6 = vector.load %arg8[%c0_4, %c0_5] : memref<1x512xf32, #tpu.memory_space<vmem>>, vector<1x512xf32>
    %7 = vector.broadcast %6 : vector<1x512xf32> to vector<8x512xf32>
    %8 = arith.addf %5, %7 : vector<8x512xf32>
    %c0_6 = arith.constant 0 : index
    %c0_7 = arith.constant 0 : index
    %9 = vector.load %arg9[%c0_6, %c0_7] : memref<8x512xf32, #tpu.memory_space<vmem>>, vector<8x512xf32>
    tpu.vector_store %arg9[%c0_6, %c0_7], %8 {strides = array<i32>} : memref<8x512xf32, #tpu.memory_space<vmem>>, vector<8x512xf32>,
    return
  }
  func.func @transform_0(%arg0: i32, %arg1: i32) -> (i32, i32) {
    %c0_i32 = arith.constant 0 : i32
    %c0_i32_0 = arith.constant 0 : i32
    return %arg0, %c0_i32 : i32, i32
  }
  func.func @transform_1(%arg0: i32, %arg1: i32) -> (i32, i32) {
    %c0_i32 = arith.constant 0 : i32
    %c0_i32_0 = arith.constant 0 : i32
    %c0_i32_1 = arith.constant 0 : i32
    return %c0_i32, %c0_i32_0 : i32, i32
  }
  func.func @transform_2(%arg0: i32, %arg1: i32) -> (i32, i32) {
    %c0_i32 = arith.constant 0 : i32
    %c0_i32_0 = arith.constant 0 : i32
    %c0_i32_1 = arith.constant 0 : i32
    return %c0_i32, %c0_i32_0 : i32, i32
  }
  func.func @transform_3(%arg0: i32, %arg1: i32) -> (i32, i32) {
    %c0_i32 = arith.constant 0 : i32
    %c0_i32_0 = arith.constant 0 : i32
    %c0_i32_1 = arith.constant 0 : i32
    return %c0_i32, %c0_i32_0 : i32, i32
  }
  func.func @transform_4(%arg0: i32, %arg1: i32) -> (i32, i32) {
    %c0_i32 = arith.constant 0 : i32
    %c0_i32_0 = arith.constant 0 : i32
    %c0_i32_1 = arith.constant 0 : i32
    return %c0_i32, %c0_i32_0 : i32, i32
  }
  func.func @transform_5(%arg0: i32, %arg1: i32) -> (i32, i32) {
    %c0_i32 = arith.constant 0 : i32
    %c0_i32_0 = arith.constant 0 : i32
    return %c0_i32, %arg1 : i32, i32
  }
  func.func @transform_6(%arg0: i32, %arg1: i32) -> (i32, i32) {
    %c0_i32 = arith.constant 0 : i32
    %c0_i32_0 = arith.constant 0 : i32
    return %c0_i32, %arg1 : i32, i32
  }
  func.func @transform_7(%arg0: i32, %arg1: i32) -> (i32, i32) {
    %c0_i32 = arith.constant 0 : i32
    return %arg0, %arg1 : i32, i32
  }
}

</mosaic_0001>

<bundles_post_ra>
// kernel: downscaling_forward.1
= control target key start
LH: loop header
LB: loop body
LE: loop exit
PB: predicated region body
PF: predicated region fallthrough
CT: control target
= control target key end

     0   :  { %s2400_s0 = inlined_call_operand.vmem [shape: f32[8,128], index: 0, kind: input, shape index: {}]   ;;  %s2401_s1 = inlined_call_operand.hbm [shape: f32[128,384], index: 1, kind: input, shape index: {}]   ;;  %s2402_s2 = inlined_call_operand.hbm [shape: f32[1,384], index: 2, kind: input, shape index: {}]   ;;  %s2403_s3 = inlined_call_operand.hbm [shape: f32[384,384], index: 3, kind: input, shape index: {}]   ;;  %s2404_s4 = inlined_call_operand.hbm [shape: f32[1,384], index: 4, kind: input, shape index: {}]   ;;  %s2405_s5 = inlined_call_operand.hbm [shape: f32[384,4608], index: 5, kind: input, shape index: {}]   ;;  %s2406_s6 = inlined_call_operand.hbm [shape: f32[1,4608], index: 6, kind: input, shape index: {}]   ;;  %s2407_s7 = inlined_call_operand.hbm [shape: f32[8,4608], index: 7, kind: output, shape index: {}]  }
   0x1   :  { %2417 = sst [smem:[#allocation23_spill]] %s2400_s0 }
   0x2   :  { %2418 = sst [smem:[#allocation24_spill]] %s2401_s1 }
   0x3   :  { %2419 = sst [smem:[#allocation25_spill]] %s2402_s2 }
   0x4   :  { %2420 = sst [smem:[#allocation26_spill]] %s2405_s5 }
   0x5   :  { %2421 = sst [smem:[#allocation27_spill]] %s2407_s7 }
   0x6   :  { %12 = vsyncpa [#allocation4], 0 }
   0x7   :  { %13 = vsyncpa [#allocation7], 0 }
   0x8   :  { %14 = vsyncpa [#allocation10], 0 }
   0x9   :  { %15 = vsyncpa [#allocation5], 0 }
   0xa   :  { %17 = vsyncpa [#allocation5 + $0x1], 0  ;;  %s1981_s24 = smov 0   ;;  %s1983_s25 = smov 0  }
   0xb   :  { %s1985_s26 = smov 0   ;;  %s1987_s27 = smov 0  }
   0xc   :  { %s1989_s28 = smov 0   ;;  %s1991_s29 = smov 0  }
   0xd LB: > { %2422 = sst [smem:[#allocation19_spill]] %s1910_s24  ;;  %s2012_s30 = sadd.s32 4294967295, %s1930_s29   ;;  %s1930_s29 = sphi %s1991_s29, %s23_s29   ;;  %s1926_s28 = sphi %s1989_s28, %s2450_s28   ;;  %s1922_s27 = sphi %s1987_s27, %s2449_s27   ;;  %s1918_s26 = sphi %s1985_s26, %s2448_s26   ;;  %s1914_s25 = sphi %s1983_s25, %s2447_s25   ;;  %s1910_s24 = sphi %s1981_s24, %s2446_s24  }
   0xe   : > { %2423 = sst [smem:[#allocation20_spill]] %s1930_s29  ;;  %s1514_s8 = sadd.s32 4294967294, %s1930_s29  }
   0xf   : > { %p159_p0 = scmp.ne.s32.totalorder %s1918_s26, %s1914_s25  ;;  %p160_p1 = scmp.eq.s32.totalorder %s1930_s29, 0 }
  0x10   : > { %p165_p2 = scmp.ne.s32.totalorder %s1914_s25, %s1910_s24  ;;  %p166_p3 = scmp.eq.s32.totalorder %s2012_s30, 0 }
  0x11   : > { %p217_p4 = scmp.eq.s32.totalorder %s2012_s30, 8  ;;  %p2023_p5 = por %p160_p1, %p159_p0 }
  0x12   : > { %p223_p6 = scmp.eq.s32.totalorder %s1514_s8, 8  ;;  %p2029_p7 = por %p166_p3, %p165_p2 }
  0x13   : > { %p2033_p8 = por %p217_p4, %p159_p0  ;;  %p1515_p10 = scmp.ge.s32.totalorder %s1930_s29, 1 }
  0x14   : > { %p2037_p9 = por %p223_p6, %p165_p2  ;;  %p230_p11 = scmp.lt.s32.totalorder %s1930_s29, 10 }
  0x15   : > { %s2426_s12 = scalar_select %p2033_p8, 1, 0 }
  0x16   : > { %s2428_s13 = scalar_select %p2037_p9, 1, 0 }
  0x17   : > { %2427 = sst [smem:[#allocation21_spill]] %s2426_s12  ;;  %p2046_p12 = pnand %p1515_p10, %p230_p11 }
  0x18   : > { %2429 = sst [smem:[#allocation22_spill]] %s2428_s13  ;;  %s1932_s18 = smov [#allocation3]  }
  0x19   : > { %s2430_s1 = sld [smem:[#allocation24_spill]]  ;;  %s250_s19 = sshll.u32 %s1932_s18, 4  ;;  %s251_s19 = int_to_ptr.vmem [resolvable:$true] %s250_s19 }
  0x1a   : > { %p1565_p13 = pneg %p2046_p12  ;;  %p1593_p1 = scmp.lt.s32.totalorder %s1930_s29, 9 }
  0x1b   : > { %s2433_s2 = sld [smem:[#allocation25_spill]]  ;;  %s2409_s14 = smov 384  }
  0x1c   : > { %p2054_p0 = pnand %p1565_p13, %p166_p3  ;;  %p2064_p2 = pnand %p1593_p1, %p2023_p5 }
  0x1d   : > { %s2410_s15 = smov 24   ;;  %s1935_s18 = smov [#allocation6]  }
  0x1e   : > { %s265_s9 = sshll.u32 %s1935_s18, 4  ;;  %s32_s10 = sadd.s32 1, %s1926_s28  ;;  %s266_s9 = int_to_ptr.vmem [resolvable:$true] %s265_s9 }
  0x1f   : > { %s248_s16 = sshll.u32 %s2430_s1, 4  ;;  %s302_s21 = sand.u32 1, %s1930_s29   ;;  %s249_s16 = int_to_ptr.hbm [resolvable:$true] %s248_s16 }
  0x20   : > { %1568 = dma.hbm_to_vmem [thread:$0]  (!%p2054_p0), %s249_s16, 6144, %s251_s19, [#allocation4], %s2409_s14, %s2409_s14, %s2410_s15  }
  0x21   : > { %s263_s23 = sshll.u32 %s2433_s2, 4  ;;  %p33_p4 = scmp.ge.s32.totalorder %s32_s10, 9  ;;  %s264_s23 = int_to_ptr.hbm [resolvable:$true] %s263_s23 }
  0x22   : > { %1571 = dma.hbm_to_vmem [thread:$0]  (!%p2054_p0), %s264_s23, 48, %s266_s9, [#allocation7]  }
  0x23   : > { %s304_s22 = sand.u32 1, %s1918_s26   ;;  %s1539_s1 = sshll.u32 %s1926_s28, 5 }
  0x24   : > { %s2452_s10 = smov (%p33_p4, %s32_s10), 0  ;;  %s1541_s2 = smul.u32 1536, %s304_s22 }
  0x25   : > { %s2435_s5 = sld [smem:[#allocation26_spill]]  ;;  %s149_s18 = ssub.s32 %s1926_s28, %s2452_s10 }
  0x26   : > { %p150_p5 = scmp.eq.s32.totalorder %s149_s18, 0  ;;  %s306_s9 = scalar_lea.vmem [#allocation11], %s1541_s2 }
  0x27   : > { %s314_s23 = sshll.u32 %s306_s9, 4  ;;  %s2436_s15 = sadd.s32 1, %s1918_s26  ;;  %s315_s23 = int_to_ptr.vmem [resolvable:$true] %s314_s23 }
  0x28   : > { %s2089_s24 = scalar_select %p150_p5, %s1918_s26, %s2436_s15  }
  0x29   : > { %s303_s29 = scalar_lea.sflag [#allocation4], %s302_s21  ;;  %s1936_s12 = smov 4608  }
  0x2a   : > { %s1937_s7 = smov 512   ;;  %s1938_s0 = smov 32  }
  0x2b   : > { %s311_s19 = scalar_lea.hbm %s2435_s5, %s1539_s1  ;;  %s274_s16 = sshll.u32 %s2403_s3, 4  ;;  %s275_s16 = int_to_ptr.hbm [resolvable:$true] %s274_s16 }
  0x2c   : > { %s312_s14 = sshll.u32 %s311_s19, 4  ;;  %s1939_s19 = smov [#allocation8]   ;;  %s313_s14 = int_to_ptr.hbm [resolvable:$true] %s312_s14 }
  0x2d   : > { %1581 = dma.hbm_to_vmem [thread:$0]  (!%p2064_p2), %s313_s14, 24576, %s315_s23, %s303_s29, %s1936_s12, %s1937_s7, %s1938_s0  }
  0x2e   : > { %s276_s2 = sshll.u32 %s1939_s19, 4  ;;  %s289_s21 = sshll.u32 %s2404_s4, 4  ;;  %s277_s2 = int_to_ptr.vmem [resolvable:$true] %s276_s2  ;;  %s290_s21 = int_to_ptr.hbm [resolvable:$true] %s289_s21 }
  0x2f   : > { %s2437_s9 = smov 24   ;;  %s2438_s5 = smov 384  }
  0x30   : > { %1574 = dma.hbm_to_vmem [thread:$0]  (!%p2054_p0), %s275_s16, 18432, %s277_s2, [#allocation7], %s2438_s5, %s2438_s5, %s2437_s9  }
  0x31   : > { %s1940_s0 = smov [#allocation9]   ;;  %s1524_s12 = sshll.u32 %s304_s22, 2 }
  0x32   : > { %s291_s7 = sshll.u32 %s1940_s0, 4  ;;  %s1525_s14 = sshll.u32 %s1926_s28, 2  ;;  %s292_s7 = int_to_ptr.vmem [resolvable:$true] %s291_s7 }
  0x33   : > { %1577 = dma.hbm_to_vmem [thread:$0]  (!%p2054_p0), %s290_s21, 48, %s292_s7, [#allocation10]  }
  0x34   : > { %s328_s23 = scalar_lea.vmem [#allocation12], %s1524_s12  ;;  %s332_s18 = scalar_lea.hbm %s2406_s6, %s1525_s14 }
  0x35   : > { %s336_s1 = sshll.u32 %s328_s23, 4  ;;  %s334_s15 = sshll.u32 %s332_s18, 4  ;;  %s337_s1 = int_to_ptr.vmem [resolvable:$true] %s336_s1  ;;  %s335_s15 = int_to_ptr.hbm [resolvable:$true] %s334_s15 }
  0x36   : > { %1584 = dma.hbm_to_vmem [thread:$0]  (!%p2064_p2), %s335_s15, 64, %s337_s1, %s303_s29  }
  0x37   : > { %345 = sbr.rel (%p2046_p12) target bundleno = 660 (0x294), region = 48 }
  0x3c   : > { %1889 = dma.done.wait (%p166_p3), [#allocation4], 6144  }
  0x3d   : > { %1891 = vsyncadd (%p166_p3), [#allocation4], 4294961152 }
  0x3e   : > { %1893 = dma.done.wait (%p166_p3), [#allocation7], 18480  }
  0x3f   : > { %1895 = vsyncadd (%p166_p3), [#allocation7], 4294948816 }
  0x40   : > { %1897 = dma.done.wait (%p166_p3), [#allocation10], 48  }
  0x41   : > { %1899 = vsyncadd (%p166_p3), [#allocation10], 4294967248  ;;  %s367_s5 = sand.u32 1, %s2012_s30   ;;  %s2128_s29 = sand.u32 1, %s1914_s25  }
  0x42   : > { %s1542_s17 = smul.u32 1536, %s2128_s29  ;;  %s368_s20 = scalar_lea.sflag [#allocation4], %s367_s5 }
  0x44   : > { %s2131_s8 = scalar_lea.vmem [#allocation11], %s1542_s17 }
  0x45   : > { %1901 = dma.done.wait (%p2029_p7), %s368_s20, 24640  }
  0x46   : > { %1903 = vsyncadd (%p2029_p7), %s368_s20, 4294942656  ;;  %s1531_s22 = sshll.u32 %s2128_s29, 2  ;;  %s1532_s16 = sshll.u32 %s2128_s29, 5 }
  0x47   : > { %s2139_s2 = scalar_lea.vmem [#allocation12], %s1531_s22  ;;  %s2141_s21 = scalar_lea.vmem [#allocation13], %s1532_s16 }
  0x48   : > { %p1533_p3 = scmp.ne.s32.totalorder %s1922_s27, 0 }
  0x49   : > { %s2439_s9 = sld [smem:[#allocation23_spill]] (!%p1533_p3) }
  0x4a   : > { %432 = sbr.rel (%p1533_p3) target bundleno = 410 (0x19a), region = 76 }
  0x4f   : > { %v479_v0 = vld [vmem:[#allocation3 + $0x168] sm:$0xff]  ;;  %v481_v1 = vld [vmem:[#allocation3 + $0x178] sm:$0xff]  ;;  %v476_v2 = vld [vmem:[#allocation3 + $0x150] sm:$0xff] }
  0x50   : > { %490 = vmatpush.msra.mxu0 %v479_v0  ;;  %530 = vmatpush.msra.mxu2 %v481_v1  ;;  %v478_v3 = vld [vmem:[#allocation3 + $0x160] sm:$0xff]  ;;  %v473_v4 = vld [vmem:[#allocation3 + $0x138] sm:$0xff]  ;;  %v475_v5 = vld [vmem:[#allocation3 + $0x148] sm:$0xff] }
  0x51   : > { %v480_v6 = vld [vmem:[#allocation3 + $0x170] sm:$0xff]  ;;  %v470_v7 = vld [vmem:[#allocation3 + $0x120] sm:$0xff]  ;;  %v477_v9 = vld [vmem:[#allocation3 + $0x158] sm:$0xff] }
  0x52   : > { %491 = vmatpush.msra.mxu0 %v476_v2  ;;  %531 = vmatpush.msra.mxu2 %v478_v3  ;;  %v472_v8 = vld [vmem:[#allocation3 + $0x130] sm:$0xff]  ;;  %v474_v10 = vld [vmem:[#allocation3 + $0x140] sm:$0xff]  ;;  %v467_v11 = vld [vmem:[#allocation3 + $0x108] sm:$0xff] }
  0x53   : > { %510 = vmatpush.msra.mxu1 %v480_v6  ;;  %v469_v12 = vld [vmem:[#allocation3 + $0x118] sm:$0xff]  ;;  %v471_v13 = vld [vmem:[#allocation3 + $0x128] sm:$0xff]  ;;  %v464_v14 = vld [vmem:[#allocation3 + $0xf0] sm:$0xff] }
  0x54   : > { %492 = vmatpush.msra.mxu0 %v473_v4  ;;  %532 = vmatpush.msra.mxu2 %v475_v5  ;;  %v466_v15 = vld [vmem:[#allocation3 + $0x100] sm:$0xff]  ;;  %v468_v16 = vld [vmem:[#allocation3 + $0x110] sm:$0xff]  ;;  %v461_v17 = vld [vmem:[#allocation3 + $0xd8] sm:$0xff] }
  0x55   : > { %511 = vmatpush.msra.mxu1 %v477_v9  ;;  %v463_v18 = vld [vmem:[#allocation3 + $0xe8] sm:$0xff]  ;;  %v465_v19 = vld [vmem:[#allocation3 + $0xf8] sm:$0xff]  ;;  %v458_v20 = vld [vmem:[#allocation3 + $0xc0] sm:$0xff] }
  0x56   : > { %493 = vmatpush.msra.mxu0 %v470_v7  ;;  %533 = vmatpush.msra.mxu2 %v472_v8  ;;  %v460_v21 = vld [vmem:[#allocation3 + $0xd0] sm:$0xff]  ;;  %v462_v22 = vld [vmem:[#allocation3 + $0xe0] sm:$0xff]  ;;  %v455_v23 = vld [vmem:[#allocation3 + $0xa8] sm:$0xff] }
  0x57   : > { %512 = vmatpush.msra.mxu1 %v474_v10  ;;  %v457_v24 = vld [vmem:[#allocation3 + $0xb8] sm:$0xff]  ;;  %v459_v25 = vld [vmem:[#allocation3 + $0xc8] sm:$0xff]  ;;  %v452_v26 = vld [vmem:[#allocation3 + $0x90] sm:$0xff] }
  0x58   : > { %494 = vmatpush.msra.mxu0 %v467_v11  ;;  %534 = vmatpush.msra.mxu2 %v469_v12  ;;  %v454_v27 = vld [vmem:[#allocation3 + $0xa0] sm:$0xff]  ;;  %v598_v28 = vld [vmem:[#allocation8 + $0x168] sm:$0xff]  ;;  %v595_v30 = vld [vmem:[#allocation8 + $0x150] sm:$0xff] }
  0x59   : > { %513 = vmatpush.msra.mxu1 %v471_v13  ;;  %v456_v29 = vld [vmem:[#allocation3 + $0xb0] sm:$0xff]  ;;  %v449_v31 = vld [vmem:[#allocation3 + $0x78] sm:$0xff]  ;;  %v451_v32 = vld [vmem:[#allocation3 + $0x88] sm:$0xff]  ;;  %705 = vmatpush.msra.mxu3 %v598_v28 }
  0x5a   : > { %495 = vmatpush.msra.mxu0 %v464_v14  ;;  %535 = vmatpush.msra.mxu2 %v466_v15  ;;  %v453_v33 = vld [vmem:[#allocation3 + $0x98] sm:$0xff]  ;;  %v446_v35 = vld [vmem:[#allocation3 + $0x60] sm:$0xff]  ;;  %v448_v36 = vld [vmem:[#allocation3 + $0x70] sm:$0xff] }
  0x5b   : > { %514 = vmatpush.msra.mxu1 %v468_v16  ;;  %v592_v34 = vld [vmem:[#allocation8 + $0x138] sm:$0xff]  ;;  %706 = vmatpush.msra.mxu3 %v595_v30  ;;  %v589_v38 = vld [vmem:[#allocation8 + $0x120] sm:$0xff]  ;;  %v586_v42 = vld [vmem:[#allocation8 + $0x108] sm:$0xff] }
  0x5c   : > { %496 = vmatpush.msra.mxu0 %v461_v17  ;;  %536 = vmatpush.msra.mxu2 %v463_v18  ;;  %v450_v37 = vld [vmem:[#allocation3 + $0x80] sm:$0xff]  ;;  %v443_v39 = vld [vmem:[#allocation3 + $0x48] sm:$0xff]  ;;  %v445_v40 = vld [vmem:[#allocation3 + $0x58] sm:$0xff] }
  0x5d   : > { %515 = vmatpush.msra.mxu1 %v465_v19  ;;  %707 = vmatpush.msra.mxu3 %v592_v34  ;;  %v447_v41 = vld [vmem:[#allocation3 + $0x68] sm:$0xff]  ;;  %v440_v43 = vld [vmem:[#allocation3 + $0x30] sm:$0xff]  ;;  %v442_v44 = vld [vmem:[#allocation3 + $0x40] sm:$0xff] }
  0x5e   : > { %497 = vmatpush.msra.mxu0 %v458_v20  ;;  %537 = vmatpush.msra.mxu2 %v460_v21  ;;  %v444_v45 = vld [vmem:[#allocation3 + $0x50] sm:$0xff]  ;;  %v437_v47 = vld [vmem:[#allocation3 + $0x18] sm:$0xff]  ;;  %v439_v48 = vld [vmem:[#allocation3 + $0x28] sm:$0xff] }
  0x5f   : > { %516 = vmatpush.msra.mxu1 %v462_v22  ;;  %708 = vmatpush.msra.mxu3 %v589_v38  ;;  %v583_v46 = vld [vmem:[#allocation8 + $0xf0] sm:$0xff]  ;;  %v580_v50 = vld [vmem:[#allocation8 + $0xd8] sm:$0xff]  ;;  %v433_v53 = vld [vmem:[%s2439_s9] sm:$0xff] }
  0x60   : > { %498 = vmatpush.msra.mxu0 %v455_v23  ;;  %538 = vmatpush.msra.mxu2 %v457_v24  ;;  %v441_v49 = vld [vmem:[#allocation3 + $0x38] sm:$0xff]  ;;  %v434_v51 = vld [vmem:[#allocation3] sm:$0xff]  ;;  %v436_v52 = vld [vmem:[#allocation3 + $0x10] sm:$0xff] }
  0x61   : > { %517 = vmatpush.msra.mxu1 %v459_v25  ;;  %709 = vmatpush.msra.mxu3 %v586_v42  ;;  %v438_v54 = vld [vmem:[#allocation3 + $0x20] sm:$0xff]  ;;  %v599_v55 = vld [vmem:[#allocation8 + $0x170] sm:$0xff]  ;;  %v646_v57 = vld [vmem:[#allocation8 + $0x2e8] sm:$0xff] }
  0x62   : > { %499 = vmatpush.msra.mxu0 %v452_v26  ;;  %539 = vmatpush.msra.mxu2 %v454_v27  ;;  %v577_v56 = vld [vmem:[#allocation8 + $0xc0] sm:$0xff]  ;;  %v596_v59 = vld [vmem:[#allocation8 + $0x158] sm:$0xff]  ;;  %v574_v60 = vld [vmem:[#allocation8 + $0xa8] sm:$0xff] }
  0x63   : > { %518 = vmatpush.msra.mxu1 %v456_v29  ;;  %710 = vmatpush.msra.mxu3 %v583_v46  ;;  %v435_v58 = vld [vmem:[#allocation3 + $0x8] sm:$0xff]  ;;  %v571_v63 = vld [vmem:[#allocation8 + $0x90] sm:$0xff]  ;;  %v568_v3 = vld [vmem:[#allocation8 + $0x78] sm:$0xff] }
  0x64   : > { %500 = vmatpush.msra.mxu0 %v449_v31  ;;  %540 = vmatpush.msra.mxu2 %v451_v32  ;;  %v694_v61 = vld [vmem:[#allocation8 + $0x468] sm:$0xff]  ;;  %v593_v62 = vld [vmem:[#allocation8 + $0x140] sm:$0xff]  ;;  %v643_v0 = vld [vmem:[#allocation8 + $0x2d0] sm:$0xff] }
  0x65   : > { %519 = vmatpush.msra.mxu1 %v453_v33  ;;  %711 = vmatpush.msra.mxu3 %v580_v50  ;;  %v691_v1 = vld [vmem:[#allocation8 + $0x450] sm:$0xff]  ;;  %v590_v2 = vld [vmem:[#allocation8 + $0x128] sm:$0xff]  ;;  %v640_v4 = vld [vmem:[#allocation8 + $0x2b8] sm:$0xff] }
  0x66   : > { %501 = vmatpush.msra.mxu0 %v446_v35  ;;  %541 = vmatpush.msra.mxu2 %v448_v36  ;;  %v688_v5 = vld [vmem:[#allocation8 + $0x438] sm:$0xff]  ;;  %v587_v6 = vld [vmem:[#allocation8 + $0x110] sm:$0xff]  ;;  %v565_v7 = vld [vmem:[#allocation8 + $0x60] sm:$0xff] }
  0x67   : > { %520 = vmatpush.msra.mxu1 %v450_v37  ;;  %712 = vmatpush.msra.mxu3 %v577_v56  ;;  %v637_v8 = vld [vmem:[#allocation8 + $0x2a0] sm:$0xff]  ;;  %v584_v10 = vld [vmem:[#allocation8 + $0xf8] sm:$0xff]  ;;  %v562_v11 = vld [vmem:[#allocation8 + $0x48] sm:$0xff] }
  0x68   : > { %502 = vmatpush.msra.mxu0 %v443_v39  ;;  %542 = vmatpush.msra.mxu2 %v445_v40  ;;  %v685_v9 = vld [vmem:[#allocation8 + $0x420] sm:$0xff]  ;;  %v634_v12 = vld [vmem:[#allocation8 + $0x288] sm:$0xff]  ;;  %v559_v15 = vld [vmem:[#allocation8 + $0x30] sm:$0xff] }
  0x69   : > { %521 = vmatpush.msra.mxu1 %v447_v41  ;;  %713 = vmatpush.msra.mxu3 %v574_v60  ;;  %v682_v13 = vld [vmem:[#allocation8 + $0x408] sm:$0xff]  ;;  %v581_v14 = vld [vmem:[#allocation8 + $0xe0] sm:$0xff]  ;;  %v631_v16 = vld [vmem:[#allocation8 + $0x270] sm:$0xff] }
  0x6a   : > { %503 = vmatpush.msra.mxu0 %v440_v43  ;;  %543 = vmatpush.msra.mxu2 %v442_v44  ;;  %v679_v17 = vld [vmem:[#allocation8 + $0x3f0] sm:$0xff]  ;;  %v578_v18 = vld [vmem:[#allocation8 + $0xc8] sm:$0xff]  ;;  %v556_v19 = vld [vmem:[#allocation8 + $0x18] sm:$0xff] }
  0x6b   : > { %522 = vmatpush.msra.mxu1 %v444_v45  ;;  %714 = vmatpush.msra.mxu3 %v571_v63  ;;  %v628_v20 = vld [vmem:[#allocation8 + $0x258] sm:$0xff]  ;;  %v575_v22 = vld [vmem:[#allocation8 + $0xb0] sm:$0xff]  ;;  %v553_v23 = vld [vmem:[#allocation8] sm:$0xff] }
  0x6c   : > { %504 = vmatpush.msra.mxu0 %v437_v47  ;;  %544 = vmatpush.msra.mxu2 %v439_v48  ;;  %v676_v21 = vld [vmem:[#allocation8 + $0x3d8] sm:$0xff]  ;;  %v625_v24 = vld [vmem:[#allocation8 + $0x240] sm:$0xff]  ;;  %v647_v27 = vld [vmem:[#allocation8 + $0x2f0] sm:$0xff] }
  0x6d   : > { %523 = vmatpush.msra.mxu1 %v441_v49  ;;  %715 = vmatpush.msra.mxu3 %v568_v3  ;;  %v673_v25 = vld [vmem:[#allocation8 + $0x3c0] sm:$0xff]  ;;  %v572_v26 = vld [vmem:[#allocation8 + $0x98] sm:$0xff]  ;;  %v622_v28 = vld [vmem:[#allocation8 + $0x228] sm:$0xff] }
  0x6e   : > { %505 = vmatpush.msra.mxu0 %v434_v51  ;;  %545 = vmatpush.msra.mxu2 %v436_v52  ;;  %v670_v29 = vld [vmem:[#allocation8 + $0x3a8] sm:$0xff]  ;;  %v569_v30 = vld [vmem:[#allocation8 + $0x80] sm:$0xff]  ;;  %v644_v31 = vld [vmem:[#allocation8 + $0x2d8] sm:$0xff] }
  0x6f   : > { %506 = vmatmul.f32.vlgmr.msra.gmra.mxu0 %v433_v53  ;;  %546 = vmatmul.f32.vlgmr.msra.gmra.mxu2 %v433_v53  ;;  %v619_v32 = vld [vmem:[#allocation8 + $0x210] sm:$0xff]  ;;  %v566_v34 = vld [vmem:[#allocation8 + $0x68] sm:$0xff]  ;;  %v641_v35 = vld [vmem:[#allocation8 + $0x2c0] sm:$0xff] }
  0x70   : > { %524 = vmatpush.msra.mxu1 %v438_v54  ;;  %765 = vmatpush.msrb.mxu2 %v599_v55  ;;  %v667_v33 = vld [vmem:[#allocation8 + $0x390] sm:$0xff]  ;;  %v616_v36 = vld [vmem:[#allocation8 + $0x1f8] sm:$0xff]  ;;  %v638_v39 = vld [vmem:[#allocation8 + $0x2a8] sm:$0xff] }
  0x71   : > { %725 = vmatpush.msrb.mxu0 %v646_v57  ;;  %716 = vmatpush.msra.mxu3 %v565_v7  ;;  %v664_v37 = vld [vmem:[#allocation8 + $0x378] sm:$0xff]  ;;  %v563_v38 = vld [vmem:[#allocation8 + $0x50] sm:$0xff]  ;;  %v613_v40 = vld [vmem:[#allocation8 + $0x1e0] sm:$0xff] }
  0x72   : > { %525 = vmatpush.msra.mxu1 %v435_v58  ;;  %766 = vmatpush.msrb.mxu2 %v596_v59  ;;  %v661_v41 = vld [vmem:[#allocation8 + $0x360] sm:$0xff]  ;;  %v560_v42 = vld [vmem:[#allocation8 + $0x38] sm:$0xff]  ;;  %v635_v43 = vld [vmem:[#allocation8 + $0x290] sm:$0xff] }
  0x73   : > { %526 = vmatmul.f32.vlgmr.msra.gmra.mxu1 %v433_v53  ;;  %726 = vmatpush.msrb.mxu0 %v643_v0  ;;  %v610_v44 = vld [vmem:[#allocation8 + $0x1c8] sm:$0xff]  ;;  %v557_v46 = vld [vmem:[#allocation8 + $0x20] sm:$0xff]  ;;  %v632_v47 = vld [vmem:[#allocation8 + $0x278] sm:$0xff] }
  0x74   : > { %745 = vmatpush.msrb.mxu1 %v694_v61  ;;  %767 = vmatpush.msrb.mxu2 %v593_v62  ;;  %v658_v45 = vld [vmem:[#allocation8 + $0x348] sm:$0xff]  ;;  %v607_v48 = vld [vmem:[#allocation8 + $0x1b0] sm:$0xff]  ;;  %v648_v51 = vld [vmem:[#allocation8 + $0x2f8] sm:$0xff] }
  0x75   : > { %727 = vmatpush.msrb.mxu0 %v640_v4  ;;  %717 = vmatpush.msra.mxu3 %v562_v11  ;;  %v655_v49 = vld [vmem:[#allocation8 + $0x330] sm:$0xff]  ;;  %v554_v50 = vld [vmem:[#allocation8 + $0x8] sm:$0xff]  ;;  %v629_v52 = vld [vmem:[#allocation8 + $0x260] sm:$0xff] }
  0x76   : > { %746 = vmatpush.msrb.mxu1 %v691_v1  ;;  %768 = vmatpush.msrb.mxu2 %v590_v2  ;;  %v652_v53 = vld [vmem:[#allocation8 + $0x318] sm:$0xff]  ;;  %v645_v55 = vld [vmem:[#allocation8 + $0x2e0] sm:$0xff]  ;;  %v626_v56 = vld [vmem:[#allocation8 + $0x248] sm:$0xff] }
  0x77   : > { %728 = vmatpush.msrb.mxu0 %v637_v8  ;;  %718 = vmatpush.msra.mxu3 %v559_v15  ;;  %v604_v54 = vld [vmem:[#allocation8 + $0x198] sm:$0xff]  ;;  %v649_v57 = vld [vmem:[#allocation8 + $0x300] sm:$0xff]  ;;  %v642_v60 = vld [vmem:[#allocation8 + $0x2c8] sm:$0xff] }
  0x78   : > { %747 = vmatpush.msrb.mxu1 %v688_v5  ;;  %769 = vmatpush.msrb.mxu2 %v587_v6  ;;  %v601_v58 = vld [vmem:[#allocation8 + $0x180] sm:$0xff]  ;;  %v600_v59 = vld [vmem:[#allocation8 + $0x178] sm:$0xff]  ;;  %v623_v61 = vld [vmem:[#allocation8 + $0x230] sm:$0xff] }
  0x79   : > { %729 = vmatpush.msrb.mxu0 %v634_v12  ;;  %719 = vmatpush.msra.mxu3 %v556_v19  ;;  %v695_v62 = vld [vmem:[#allocation8 + $0x470] sm:$0xff]  ;;  %v597_v63 = vld [vmem:[#allocation8 + $0x160] sm:$0xff]  ;;  %v620_v1 = vld [vmem:[#allocation8 + $0x218] sm:$0xff] }
  0x7a   : > { %748 = vmatpush.msrb.mxu1 %v685_v9  ;;  %770 = vmatpush.msrb.mxu2 %v584_v10  ;;  %v639_v0 = vld [vmem:[#allocation8 + $0x2b0] sm:$0xff]  ;;  %v692_v2 = vld [vmem:[#allocation8 + $0x458] sm:$0xff]  ;;  %v594_v3 = vld [vmem:[#allocation8 + $0x148] sm:$0xff] }
  0x7b   : > { %730 = vmatpush.msrb.mxu0 %v631_v16  ;;  %720 = vmatpush.msra.mxu3 %v553_v23  ;;  %v636_v4 = vld [vmem:[#allocation8 + $0x298] sm:$0xff]  ;;  %v617_v5 = vld [vmem:[#allocation8 + $0x200] sm:$0xff]  ;;  %v591_v7 = vld [vmem:[#allocation8 + $0x130] sm:$0xff] }
  0x7c   : > { %749 = vmatpush.msrb.mxu1 %v682_v13  ;;  %771 = vmatpush.msrb.mxu2 %v581_v14  ;;  %v689_v6 = vld [vmem:[#allocation8 + $0x440] sm:$0xff]  ;;  %v614_v9 = vld [vmem:[#allocation8 + $0x1e8] sm:$0xff]  ;;  %v588_v11 = vld [vmem:[#allocation8 + $0x118] sm:$0xff] }
  0x7d   : > { %731 = vmatpush.msrb.mxu0 %v628_v20  ;;  %785 = vmatpush.msrb.mxu3 %v647_v27  ;;  %v633_v8 = vld [vmem:[#allocation8 + $0x280] sm:$0xff]  ;;  %v686_v10 = vld [vmem:[#allocation8 + $0x428] sm:$0xff]  ;;  %v611_v13 = vld [vmem:[#allocation8 + $0x1d0] sm:$0xff] }
  0x7e   : > { %750 = vmatpush.msrb.mxu1 %v679_v17  ;;  %772 = vmatpush.msrb.mxu2 %v578_v18  ;;  %v630_v12 = vld [vmem:[#allocation8 + $0x268] sm:$0xff]  ;;  %v683_v14 = vld [vmem:[#allocation8 + $0x410] sm:$0xff]  ;;  %v585_v15 = vld [vmem:[#allocation8 + $0x100] sm:$0xff] }
  0x7f   : > { %732 = vmatpush.msrb.mxu0 %v625_v24  ;;  %786 = vmatpush.msrb.mxu3 %v644_v31  ;;  %v627_v16 = vld [vmem:[#allocation8 + $0x250] sm:$0xff]  ;;  %v608_v17 = vld [vmem:[#allocation8 + $0x1b8] sm:$0xff]  ;;  %v582_v19 = vld [vmem:[#allocation8 + $0xe8] sm:$0xff] }
  0x80   : > { %751 = vmatpush.msrb.mxu1 %v676_v21  ;;  %773 = vmatpush.msrb.mxu2 %v575_v22  ;;  %v680_v18 = vld [vmem:[#allocation8 + $0x3f8] sm:$0xff]  ;;  %v605_v21 = vld [vmem:[#allocation8 + $0x1a0] sm:$0xff]  ;;  %v579_v23 = vld [vmem:[#allocation8 + $0xd0] sm:$0xff] }
  0x81   : > { %733 = vmatpush.msrb.mxu0 %v622_v28  ;;  %787 = vmatpush.msrb.mxu3 %v641_v35  ;;  %v624_v20 = vld [vmem:[#allocation8 + $0x238] sm:$0xff]  ;;  %v677_v22 = vld [vmem:[#allocation8 + $0x3e0] sm:$0xff]  ;;  %v618_v28 = vld [vmem:[#allocation8 + $0x208] sm:$0xff] }
  0x82   : > { %752 = vmatpush.msrb.mxu1 %v673_v25  ;;  %774 = vmatpush.msrb.mxu2 %v572_v26  ;;  %v621_v24 = vld [vmem:[#allocation8 + $0x220] sm:$0xff]  ;;  %v602_v25 = vld [vmem:[#allocation8 + $0x188] sm:$0xff]  ;;  %v576_v27 = vld [vmem:[#allocation8 + $0xb8] sm:$0xff] }
  0x83   : > { %734 = vmatpush.msrb.mxu0 %v619_v32  ;;  %788 = vmatpush.msrb.mxu3 %v638_v39  ;;  %v674_v26 = vld [vmem:[#allocation8 + $0x3c8] sm:$0xff]  ;;  %v615_v31 = vld [vmem:[#allocation8 + $0x1f0] sm:$0xff]  ;;  %v668_v32 = vld [vmem:[#allocation8 + $0x398] sm:$0xff] }
  0x84   : > { %753 = vmatpush.msrb.mxu1 %v670_v29  ;;  %775 = vmatpush.msrb.mxu2 %v569_v30  ;;  %v671_v29 = vld [vmem:[#allocation8 + $0x3b0] sm:$0xff]  ;;  %v573_v30 = vld [vmem:[#allocation8 + $0xa0] sm:$0xff]  ;;  %v564_v39 = vld [vmem:[#allocation8 + $0x58] sm:$0xff] }
  0x85   : > { %735 = vmatpush.msrb.mxu0 %v616_v36  ;;  %789 = vmatpush.msrb.mxu3 %v635_v43  ;;  %v665_v35 = vld [vmem:[#allocation8 + $0x380] sm:$0xff]  ;;  %v567_v36 = vld [vmem:[#allocation8 + $0x70] sm:$0xff] }
  0x86   : > { %754 = vmatpush.msrb.mxu1 %v667_v33  ;;  %776 = vmatpush.msrb.mxu2 %v566_v34  ;;  %v570_v33 = vld [vmem:[#allocation8 + $0x88] sm:$0xff]  ;;  %v612_v34 = vld [vmem:[#allocation8 + $0x1d8] sm:$0xff]  ;;  %v603_v43 = vld [vmem:[#allocation8 + $0x190] sm:$0xff] }
  0x87   : > { %736 = vmatpush.msrb.mxu0 %v613_v40  ;;  %790 = vmatpush.msrb.mxu3 %v632_v47  ;;  %v606_v40 = vld [vmem:[#allocation8 + $0x1a8] sm:$0xff]  ;;  %v555_v47 = vld [vmem:[#allocation8 + $0x10] sm:$0xff] }
  0x88   : > { %755 = vmatpush.msrb.mxu1 %v664_v37  ;;  %777 = vmatpush.msrb.mxu2 %v563_v38  ;;  %v609_v37 = vld [vmem:[#allocation8 + $0x1c0] sm:$0xff]  ;;  %v662_v38 = vld [vmem:[#allocation8 + $0x368] sm:$0xff] }
  0x89   : > { %737 = vmatpush.msrb.mxu0 %v610_v44  ;;  %791 = vmatpush.msrb.mxu3 %v629_v52  ;;  %v656_v44 = vld [vmem:[#allocation8 + $0x338] sm:$0xff] }
  0x8a   : > { %756 = vmatpush.msrb.mxu1 %v661_v41  ;;  %778 = vmatpush.msrb.mxu2 %v560_v42  ;;  %v659_v41 = vld [vmem:[#allocation8 + $0x350] sm:$0xff]  ;;  %v561_v42 = vld [vmem:[#allocation8 + $0x40] sm:$0xff] }
  0x8b   : > { %738 = vmatpush.msrb.mxu0 %v607_v48  ;;  %792 = vmatpush.msrb.mxu3 %v626_v56  ;;  %v650_v48 = vld [vmem:[#allocation8 + $0x308] sm:$0xff] }
  0x8c   : > { %757 = vmatpush.msrb.mxu1 %v658_v45  ;;  %779 = vmatpush.msrb.mxu2 %v557_v46  ;;  %v558_v45 = vld [vmem:[#allocation8 + $0x28] sm:$0xff]  ;;  %v653_v46 = vld [vmem:[#allocation8 + $0x320] sm:$0xff] }
  0x8d   : > { %739 = vmatpush.msrb.mxu0 %v604_v54  ;;  %793 = vmatpush.msrb.mxu3 %v623_v61 }
  0x8e   : > { %758 = vmatpush.msrb.mxu1 %v655_v49  ;;  %780 = vmatpush.msrb.mxu2 %v554_v50  ;;  %v482_v49 = vld [vmem:[#allocation6] sm:$0x7] }
  0x8f   : > { %740 = vmatpush.msrb.mxu0 %v601_v58  ;;  %794 = vmatpush.msrb.mxu3 %v620_v1  ;;  %v484_v50 = vperm.slane %v482_v49, 0  ;;  %v486_v56 = vperm.slane %v482_v49, 2  ;;  %v693_v58 = vld [vmem:[#allocation8 + $0x460] sm:$0xff]  ;;  %v687_v1 = vld [vmem:[#allocation8 + $0x430] sm:$0xff] }
  0x90   : > { %845 = vmatpush.msra.mxu2 %v648_v51  ;;  %759 = vmatpush.msrb.mxu1 %v652_v53  ;;  %v485_v53 = vperm.slane %v482_v49, 1 }
  0x91   : > { %805 = vmatpush.msra.mxu0 %v695_v62  ;;  %795 = vmatpush.msrb.mxu3 %v617_v5  ;;  %v675_v5 = vld [vmem:[#allocation8 + $0x3d0] sm:$0xff] }
  0x92   : > { %846 = vmatpush.msra.mxu2 %v645_v55  ;;  %760 = vmatpush.msrb.mxu1 %v649_v57  ;;  %v696_v55 = vld [vmem:[#allocation8 + $0x478] sm:$0xff] }
  0x93   : > { %806 = vmatpush.msra.mxu0 %v692_v2  ;;  %796 = vmatpush.msrb.mxu3 %v614_v9  ;;  %v684_v2 = vld [vmem:[#allocation8 + $0x418] sm:$0xff]  ;;  %v663_v9 = vld [vmem:[#allocation8 + $0x370] sm:$0xff] }
  0x94   : > { %825 = vmatpush.msra.mxu1 %v600_v59  ;;  %847 = vmatpush.msra.mxu2 %v642_v60 }
  0x95   : > { %807 = vmatpush.msra.mxu0 %v689_v6  ;;  %797 = vmatpush.msrb.mxu3 %v611_v13  ;;  %v672_v6 = vld [vmem:[#allocation8 + $0x3b8] sm:$0xff]  ;;  %v651_v13 = vld [vmem:[#allocation8 + $0x310] sm:$0xff] }
  0x96   : > { %826 = vmatpush.msra.mxu1 %v597_v63  ;;  %848 = vmatpush.msra.mxu2 %v639_v0  ;;  %v690_v63 = vld [vmem:[#allocation8 + $0x448] sm:$0xff] }
  0x97   : > { %808 = vmatpush.msra.mxu0 %v686_v10  ;;  %798 = vmatpush.msrb.mxu3 %v608_v17  ;;  %v660_v10 = vld [vmem:[#allocation8 + $0x358] sm:$0xff] }
  0x98   : > { %827 = vmatpush.msra.mxu1 %v594_v3  ;;  %849 = vmatpush.msra.mxu2 %v636_v4  ;;  %v681_v3 = vld [vmem:[#allocation8 + $0x400] sm:$0xff]  ;;  %v678_v4 = vld [vmem:[#allocation8 + $0x3e8] sm:$0xff] }
  0x99   : > { %809 = vmatpush.msra.mxu0 %v683_v14  ;;  %799 = vmatpush.msrb.mxu3 %v605_v21  ;;  %v697_v14 = vld [vmem:[#allocation9] sm:$0x7] }
  0x9a   : > { %828 = vmatpush.msra.mxu1 %v591_v7  ;;  %850 = vmatpush.msra.mxu2 %v633_v8  ;;  %v669_v7 = vld [vmem:[#allocation8 + $0x3a0] sm:$0xff]  ;;  %v666_v8 = vld [vmem:[#allocation8 + $0x388] sm:$0xff] }
  0x9b   : > { %810 = vmatpush.msra.mxu0 %v680_v18  ;;  %800 = vmatpush.msrb.mxu3 %v602_v25 }
  0x9c   : > { %829 = vmatpush.msra.mxu1 %v588_v11  ;;  %851 = vmatpush.msra.mxu2 %v630_v12  ;;  %v657_v11 = vld [vmem:[#allocation8 + $0x340] sm:$0xff]  ;;  %v654_v12 = vld [vmem:[#allocation8 + $0x328] sm:$0xff] }
  0x9d   : > { %811 = vmatpush.msra.mxu0 %v677_v22 }
  0x9e   : > { %830 = vmatpush.msra.mxu1 %v585_v15  ;;  %852 = vmatpush.msra.mxu2 %v627_v16  ;;  %v699_v15 = vperm.slane %v697_v14, 0 }
  0x9f   : > { %812 = vmatpush.msra.mxu0 %v674_v26 }
  0xa0   : > { %831 = vmatpush.msra.mxu1 %v582_v19  ;;  %853 = vmatpush.msra.mxu2 %v624_v20  ;;  %v700_v19 = vperm.slane %v697_v14, 1 }
  0xa1   : > { %813 = vmatpush.msra.mxu0 %v671_v29 }
  0xa2   : > { %832 = vmatpush.msra.mxu1 %v579_v23  ;;  %854 = vmatpush.msra.mxu2 %v621_v24 }
  0xa3   : > { %814 = vmatpush.msra.mxu0 %v668_v32 }
  0xa4   : > { %833 = vmatpush.msra.mxu1 %v576_v27  ;;  %855 = vmatpush.msra.mxu2 %v618_v28 }
  0xa5   : > { %815 = vmatpush.msra.mxu0 %v665_v35 }
  0xa6   : > { %834 = vmatpush.msra.mxu1 %v573_v30  ;;  %856 = vmatpush.msra.mxu2 %v615_v31  ;;  %v701_v31 = vperm.slane %v697_v14, 2 }
  0xa7   : > { %816 = vmatpush.msra.mxu0 %v662_v38 }
  0xa8   : > { %835 = vmatpush.msra.mxu1 %v570_v33  ;;  %857 = vmatpush.msra.mxu2 %v612_v34 }
  0xa9   : > { %817 = vmatpush.msra.mxu0 %v659_v41 }
  0xaa   : > { %836 = vmatpush.msra.mxu1 %v567_v36  ;;  %858 = vmatpush.msra.mxu2 %v609_v37 }
  0xab   : > { %818 = vmatpush.msra.mxu0 %v656_v44 }
  0xac   : > { %837 = vmatpush.msra.mxu1 %v564_v39  ;;  %859 = vmatpush.msra.mxu2 %v606_v40 }
  0xad   : > { %819 = vmatpush.msra.mxu0 %v653_v46 }
  0xae   : > { %838 = vmatpush.msra.mxu1 %v561_v42  ;;  %860 = vmatpush.msra.mxu2 %v603_v43 }
  0xaf   : > { %820 = vmatpush.msra.mxu0 %v650_v48 }
  0xb0   : > { %839 = vmatpush.msra.mxu1 %v558_v45 }
  0xb2   : > { %840 = vmatpush.msra.mxu1 %v555_v47 }
  0xec   : > { %v507_v51 = vpop.f32.mrf.mxu0 }
  0xed   : > { %v508_v52 = vadd.f32 %v507_v51, %v484_v50 }
  0xef   : > { %v550_v54 = vmax.f32 %v508_v52, 0.0 }
  0xf0   : > { %v527_v57 = vpop.f32.mrf.mxu1 }
  0xf1   : > { %721 = vmatmul.f32.vlgmr.msra.gmra.mxu3 %v550_v54  ;;  %781 = vmatmul.f32.vlgmr.msrb.gmra.mxu2 %v550_v54  ;;  %v528_v59 = vadd.f32 %v527_v57, %v485_v53 }
  0xf2   : > { %865 = vmatpush.msra.mxu3 %v696_v55  ;;  %v547_v60 = vpop.f32.mrf.mxu2 }
  0xf3   : > { %v548_v61 = vadd.f32 %v547_v60, %v486_v56  ;;  %v551_v62 = vmax.f32 %v528_v59, 0.0 }
  0xf4   : > { %866 = vmatpush.msra.mxu3 %v693_v58 }
  0xf5   : > { %v552_v0 = vmax.f32 %v548_v61, 0.0  ;;  %741 = vmatmul.f32.vlgmr.msrb.gmra.mxu0 %v551_v62 }
  0xf6   : > { %867 = vmatpush.msra.mxu3 %v690_v63 }
  0xf7   : > { %761 = vmatmul.f32.vlgmr.msrb.gmra.mxu1 %v552_v0 }
  0xf8   : > { %868 = vmatpush.msra.mxu3 %v687_v1 }
  0xf9   : > { %801 = vmatmul.f32.vlgmr.msrb.gmra.mxu3 %v551_v62  ;;  %861 = vmatmul.f32.vlgmr.msra.gmra.mxu2 %v551_v62 }
  0xfa   : > { %869 = vmatpush.msra.mxu3 %v684_v2 }
  0xfc   : > { %870 = vmatpush.msra.mxu3 %v681_v3 }
  0xfd   : > { %821 = vmatmul.f32.vlgmr.msra.gmra.mxu0 %v552_v0 }
  0xfe   : > { %871 = vmatpush.msra.mxu3 %v678_v4 }
  0xff   : > { %841 = vmatmul.f32.vlgmr.msra.gmra.mxu1 %v550_v54 }
 0x100   : > { %872 = vmatpush.msra.mxu3 %v675_v5 }
 0x102   : > { %873 = vmatpush.msra.mxu3 %v672_v6 }
 0x104   : > { %874 = vmatpush.msra.mxu3 %v669_v7 }
 0x106   : > { %875 = vmatpush.msra.mxu3 %v666_v8 }
 0x108   : > { %876 = vmatpush.msra.mxu3 %v663_v9 }
 0x10a   : > { %877 = vmatpush.msra.mxu3 %v660_v10 }
 0x10c   : > { %878 = vmatpush.msra.mxu3 %v657_v11 }
 0x10e   : > { %879 = vmatpush.msra.mxu3 %v654_v12 }
 0x110   : > { %880 = vmatpush.msra.mxu3 %v651_v13 }
 0x111   : > { %881 = vmatmul.f32.vlgmr.msra.gmra.mxu3 %v552_v0 }
 0x172   : > { %v742_v16 = vpop.f32.mrf.mxu0 }
 0x174   : > { %v722_v17 = vpop.f32.mrf.mxu3  ;;  %v762_v21 = vpop.f32.mrf.mxu1 }
 0x175   : > { %v723_v18 = vadd.f32 %v722_v17, %v699_v15  ;;  %v782_v22 = vpop.f32.mrf.mxu2 }
 0x176   : > { %v783_v24 = vadd.f32 %v782_v22, %v700_v19 }
 0x177   : > { %v743_v20 = vadd.f32 %v742_v16, %v723_v18 }
 0x179   : > { %v763_v23 = vadd.f32 %v762_v21, %v743_v20 }
 0x17a   : > { %v822_v27 = vpop.f32.mrf.mxu0 }
 0x17b   : > { %v885_v25 = vmax.f32 %v763_v23, 0.0 }
 0x17c   : > { %v802_v26 = vpop.f32.mrf.mxu3  ;;  %v842_v32 = vpop.f32.mrf.mxu1 }
 0x17d   : > { %888 = vst [vmem:[#allocation2 + $0x10] sm:$0xff] %v885_v25  ;;  %v803_v28 = vadd.f32 %v802_v26, %v783_v24  ;;  %v843_v33 = vadd.f32 %v842_v32, %v701_v31  ;;  %v862_v34 = vpop.f32.mrf.mxu2 }
 0x17f   : > { %v823_v29 = vadd.f32 %v822_v27, %v803_v28  ;;  %v863_v35 = vadd.f32 %v862_v34, %v843_v33 }
 0x181   : > { %v886_v30 = vmax.f32 %v823_v29, 0.0 }
 0x183   : > { %889 = vst [vmem:[#allocation2] sm:$0xff] %v886_v30 }
 0x194   : > { %v882_v36 = vpop.f32.mrf.mxu3 }
 0x195   : > { %v883_v37 = vadd.f32 %v882_v36, %v863_v35 }
 0x197   : > { %v887_v38 = vmax.f32 %v883_v37, 0.0 }
 0x199   : > { %890 = vst [vmem:[#allocation2 + $0x8] sm:$0xff] %v887_v38 }
 0x19a PF: > { %v1082_v39 = vld [vmem:[%s2131_s8 + $0x5e0] sm:$0xff]  ;;  %v955_v42 = vld [vmem:[%s2131_s8 + $0x1e8] sm:$0xff]  ;;  %v956_v37 = vld [vmem:[%s2131_s8 + $0x1f0] sm:$0xff]  ;;  %s1540_s0 = sshll.u32 %s1922_s27, 5  ;;  %s2440_s14 = sld [smem:[#allocation27_spill]] }
 0x19b   : > { %v954_v40 = vld [vmem:[%s2131_s8 + $0x1e0] sm:$0xff]  ;;  %1136 = vmatpush.msra.mxu2 %v1082_v39  ;;  %1156 = vmatpush.msra.mxu3 %v955_v42  ;;  %v951_v46 = vld [vmem:[%s2131_s8 + $0x1c8] sm:$0xff]  ;;  %s1356_s13 = sshll.u32 %s2141_s21, 4  ;;  %s1341_s27 = scalar_lea.sflag [#allocation5], %s2128_s29  ;;  %s1357_s13 = int_to_ptr.vmem [resolvable:$true] %s1356_s13 }
 0x19c   : > { %v1078_v41 = vld [vmem:[%s2131_s8 + $0x5c0] sm:$0xff]  ;;  %1096 = vmatpush.msra.mxu0 %v954_v40  ;;  %v947_v49 = vld [vmem:[%s2131_s8 + $0x1a8] sm:$0xff]  ;;  %v1020_v40 = vld [vmem:[%s2131_s8 + $0x3f0] sm:$0xff] }
 0x19d   : > { %v950_v43 = vld [vmem:[%s2131_s8 + $0x1c0] sm:$0xff]  ;;  %1137 = vmatpush.msra.mxu2 %v1078_v41  ;;  %1157 = vmatpush.msra.mxu3 %v951_v46  ;;  %v943_v53 = vld [vmem:[%s2131_s8 + $0x188] sm:$0xff]  ;;  %v952_v41 = vld [vmem:[%s2131_s8 + $0x1d0] sm:$0xff] }
 0x19e   : > { %v1018_v44 = vld [vmem:[%s2131_s8 + $0x3e0] sm:$0xff]  ;;  %1097 = vmatpush.msra.mxu0 %v950_v43  ;;  %v939_v57 = vld [vmem:[%s2131_s8 + $0x168] sm:$0xff]  ;;  %v1016_v46 = vld [vmem:[%s2131_s8 + $0x3d0] sm:$0xff] }
 0x19f   : > { %1116 = vmatpush.msra.mxu1 %v1018_v44  ;;  %v1074_v45 = vld [vmem:[%s2131_s8 + $0x5a0] sm:$0xff]  ;;  %1158 = vmatpush.msra.mxu3 %v947_v49  ;;  %v935_v61 = vld [vmem:[%s2131_s8 + $0x148] sm:$0xff]  ;;  %v944_v49 = vld [vmem:[%s2131_s8 + $0x190] sm:$0xff] }
 0x1a0   : > { %v946_v47 = vld [vmem:[%s2131_s8 + $0x1a0] sm:$0xff]  ;;  %1138 = vmatpush.msra.mxu2 %v1074_v45  ;;  %v931_v1 = vld [vmem:[%s2131_s8 + $0x128] sm:$0xff]  ;;  %v948_v45 = vld [vmem:[%s2131_s8 + $0x1b0] sm:$0xff]  ;;  %s1354_s23 = scalar_lea.hbm %s2440_s14, %s1540_s0  ;;  %s1856_s20 = scalar_lea.hbm %s2440_s14, 288 }
 0x1a1   : > { %v1014_v48 = vld [vmem:[%s2131_s8 + $0x3c0] sm:$0xff]  ;;  %1098 = vmatpush.msra.mxu0 %v946_v47  ;;  %1159 = vmatpush.msra.mxu3 %v943_v53  ;;  %v927_v5 = vld [vmem:[%s2131_s8 + $0x108] sm:$0xff]  ;;  %v940_v53 = vld [vmem:[%s2131_s8 + $0x170] sm:$0xff]  ;;  %s1358_s19 = sshll.u32 %s1354_s23, 4  ;;  %s1359_s19 = int_to_ptr.hbm [resolvable:$true] %s1358_s19 }
 0x1a2   : > { %1117 = vmatpush.msra.mxu1 %v1014_v48  ;;  %v1070_v50 = vld [vmem:[%s2131_s8 + $0x580] sm:$0xff]  ;;  %v923_v9 = vld [vmem:[%s2131_s8 + $0xe8] sm:$0xff]  ;;  %s1850_s18 = sshra.s32 %s1359_s19, 4  ;;  %s1851_s18 = int_to_ptr.hbm [resolvable:$true] %s1850_s18 }
 0x1a3   : > { %v942_v51 = vld [vmem:[%s2131_s8 + $0x180] sm:$0xff]  ;;  %1139 = vmatpush.msra.mxu2 %v1070_v50  ;;  %1160 = vmatpush.msra.mxu3 %v939_v57  ;;  %v919_v13 = vld [vmem:[%s2131_s8 + $0xc8] sm:$0xff]  ;;  %v1012_v50 = vld [vmem:[%s2131_s8 + $0x3b0] sm:$0xff]  ;;  %s1852_s15 = scalar_lea.hbm %s1851_s18, 32  ;;  %p1857_p11 = scmp.lt.s32.totalorder %s1851_s18, %s2440_s14 }
 0x1a4   : > { %v1010_v52 = vld [vmem:[%s2131_s8 + $0x3a0] sm:$0xff]  ;;  %1099 = vmatpush.msra.mxu0 %v942_v51  ;;  %v915_v17 = vld [vmem:[%s2131_s8 + $0xa8] sm:$0xff]  ;;  %v936_v57 = vld [vmem:[%s2131_s8 + $0x150] sm:$0xff]  ;;  %p1853_p6 = scmp.ne.s32.totalorder %s1851_s18, %s1852_s15  ;;  %p1858_p12 = scmp.lt.s32.totalorder %s1856_s20, %s1852_s15 }
 0x1a5   : > { %v1006_v54 = vld [vmem:[%s2131_s8 + $0x380] sm:$0xff]  ;;  %1118 = vmatpush.msra.mxu1 %v1010_v52  ;;  %1161 = vmatpush.msra.mxu3 %v935_v61  ;;  %v911_v21 = vld [vmem:[%s2131_s8 + $0x88] sm:$0xff]  ;;  %v932_v61 = vld [vmem:[%s2131_s8 + $0x130] sm:$0xff] }
 0x1a6   : > { %v1066_v55 = vld [vmem:[%s2131_s8 + $0x560] sm:$0xff]  ;;  %v907_v25 = vld [vmem:[%s2131_s8 + $0x68] sm:$0xff]  ;;  %p1854_p7 = pnand %p1853_p6, %p2033_p8  ;;  %p1859_p13 = por %p1858_p12, %p1857_p11 }
 0x1a7   : > { %v938_v56 = vld [vmem:[%s2131_s8 + $0x160] sm:$0xff]  ;;  %1119 = vmatpush.msra.mxu1 %v1006_v54  ;;  %1140 = vmatpush.msra.mxu2 %v1066_v55  ;;  %v903_v29 = vld [vmem:[%s2131_s8 + $0x48] sm:$0xff]  ;;  %v1008_v54 = vld [vmem:[%s2131_s8 + $0x390] sm:$0xff] }
 0x1a8   : > { %v1002_v58 = vld [vmem:[%s2131_s8 + $0x360] sm:$0xff]  ;;  %1100 = vmatpush.msra.mxu0 %v938_v56  ;;  %1162 = vmatpush.msra.mxu3 %v931_v1  ;;  %v899_v33 = vld [vmem:[%s2131_s8 + $0x28] sm:$0xff]  ;;  %v928_v1 = vld [vmem:[%s2131_s8 + $0x110] sm:$0xff]  ;;  %p1855_p10 = pneg %p1854_p7 }
 0x1a9   : > { %v1062_v59 = vld [vmem:[%s2131_s8 + $0x540] sm:$0xff]  ;;  %1120 = vmatpush.msra.mxu1 %v1002_v58  ;;  %v895_v38 = vld [vmem:[%s2131_s8 + $0x8] sm:$0xff]  ;;  %v1004_v58 = vld [vmem:[%s2131_s8 + $0x370] sm:$0xff] }
 0x1aa   : > { %v934_v60 = vld [vmem:[%s2131_s8 + $0x140] sm:$0xff]  ;;  %1141 = vmatpush.msra.mxu2 %v1062_v59  ;;  %1163 = vmatpush.msra.mxu3 %v927_v5  ;;  %v1019_v39 = vld [vmem:[%s2131_s8 + $0x3e8] sm:$0xff]  ;;  %v924_v5 = vld [vmem:[%s2131_s8 + $0xf0] sm:$0xff]  ;;  %p1860_p0 = pnand %p1859_p13, %p1855_p10 }
 0x1ab   : > { %v998_v62 = vld [vmem:[%s2131_s8 + $0x340] sm:$0xff]  ;;  %1101 = vmatpush.msra.mxu0 %v934_v60  ;;  %v1015_v43 = vld [vmem:[%s2131_s8 + $0x3c8] sm:$0xff] }
 0x1ac   : > { %v1058_v63 = vld [vmem:[%s2131_s8 + $0x520] sm:$0xff]  ;;  %1121 = vmatpush.msra.mxu1 %v998_v62  ;;  %1164 = vmatpush.msra.mxu3 %v923_v9  ;;  %v1083_v44 = vld [vmem:[%s2131_s8 + $0x5e8] sm:$0xff]  ;;  %v1000_v62 = vld [vmem:[%s2131_s8 + $0x350] sm:$0xff] }
 0x1ad   : > { %v930_v0 = vld [vmem:[%s2131_s8 + $0x120] sm:$0xff]  ;;  %1142 = vmatpush.msra.mxu2 %v1058_v63  ;;  %v1011_v47 = vld [vmem:[%s2131_s8 + $0x3a8] sm:$0xff]  ;;  %v920_v9 = vld [vmem:[%s2131_s8 + $0xd0] sm:$0xff] }
 0x1ae   : > { %v994_v2 = vld [vmem:[%s2131_s8 + $0x320] sm:$0xff]  ;;  %1102 = vmatpush.msra.mxu0 %v930_v0  ;;  %1165 = vmatpush.msra.mxu3 %v919_v13  ;;  %v1079_v48 = vld [vmem:[%s2131_s8 + $0x5c8] sm:$0xff]  ;;  %v916_v13 = vld [vmem:[%s2131_s8 + $0xb0] sm:$0xff] }
 0x1af   : > { %v1054_v3 = vld [vmem:[%s2131_s8 + $0x500] sm:$0xff]  ;;  %1122 = vmatpush.msra.mxu1 %v994_v2  ;;  %v1007_v51 = vld [vmem:[%s2131_s8 + $0x388] sm:$0xff]  ;;  %v996_v2 = vld [vmem:[%s2131_s8 + $0x330] sm:$0xff] }
 0x1b0   : > { %v926_v4 = vld [vmem:[%s2131_s8 + $0x100] sm:$0xff]  ;;  %1143 = vmatpush.msra.mxu2 %v1054_v3  ;;  %1166 = vmatpush.msra.mxu3 %v915_v17  ;;  %v1075_v52 = vld [vmem:[%s2131_s8 + $0x5a8] sm:$0xff]  ;;  %v912_v17 = vld [vmem:[%s2131_s8 + $0x90] sm:$0xff] }
 0x1b1   : > { %v990_v6 = vld [vmem:[%s2131_s8 + $0x300] sm:$0xff]  ;;  %1103 = vmatpush.msra.mxu0 %v926_v4  ;;  %v1003_v55 = vld [vmem:[%s2131_s8 + $0x368] sm:$0xff] }
 0x1b2   : > { %v1050_v7 = vld [vmem:[%s2131_s8 + $0x4e0] sm:$0xff]  ;;  %1123 = vmatpush.msra.mxu1 %v990_v6  ;;  %1167 = vmatpush.msra.mxu3 %v911_v21  ;;  %v1071_v56 = vld [vmem:[%s2131_s8 + $0x588] sm:$0xff]  ;;  %v992_v6 = vld [vmem:[%s2131_s8 + $0x310] sm:$0xff] }
 0x1b3   : > { %v922_v8 = vld [vmem:[%s2131_s8 + $0xe0] sm:$0xff]  ;;  %1144 = vmatpush.msra.mxu2 %v1050_v7  ;;  %v999_v59 = vld [vmem:[%s2131_s8 + $0x348] sm:$0xff]  ;;  %v908_v21 = vld [vmem:[%s2131_s8 + $0x70] sm:$0xff] }
 0x1b4   : > { %v986_v10 = vld [vmem:[%s2131_s8 + $0x2e0] sm:$0xff]  ;;  %1104 = vmatpush.msra.mxu0 %v922_v8  ;;  %1168 = vmatpush.msra.mxu3 %v907_v25  ;;  %v1067_v60 = vld [vmem:[%s2131_s8 + $0x568] sm:$0xff]  ;;  %v904_v25 = vld [vmem:[%s2131_s8 + $0x50] sm:$0xff] }
 0x1b5   : > { %v1046_v11 = vld [vmem:[%s2131_s8 + $0x4c0] sm:$0xff]  ;;  %1124 = vmatpush.msra.mxu1 %v986_v10  ;;  %v995_v63 = vld [vmem:[%s2131_s8 + $0x328] sm:$0xff]  ;;  %v988_v10 = vld [vmem:[%s2131_s8 + $0x2f0] sm:$0xff] }
 0x1b6   : > { %v918_v12 = vld [vmem:[%s2131_s8 + $0xc0] sm:$0xff]  ;;  %1145 = vmatpush.msra.mxu2 %v1046_v11  ;;  %1169 = vmatpush.msra.mxu3 %v903_v29  ;;  %v1063_v0 = vld [vmem:[%s2131_s8 + $0x548] sm:$0xff]  ;;  %v900_v29 = vld [vmem:[%s2131_s8 + $0x30] sm:$0xff] }
 0x1b7   : > { %v982_v14 = vld [vmem:[%s2131_s8 + $0x2c0] sm:$0xff]  ;;  %1105 = vmatpush.msra.mxu0 %v918_v12  ;;  %v991_v3 = vld [vmem:[%s2131_s8 + $0x308] sm:$0xff] }
 0x1b8   : > { %v1042_v15 = vld [vmem:[%s2131_s8 + $0x4a0] sm:$0xff]  ;;  %1125 = vmatpush.msra.mxu1 %v982_v14  ;;  %1170 = vmatpush.msra.mxu3 %v899_v33  ;;  %v1059_v4 = vld [vmem:[%s2131_s8 + $0x528] sm:$0xff]  ;;  %v984_v14 = vld [vmem:[%s2131_s8 + $0x2d0] sm:$0xff] }
 0x1b9   : > { %v914_v16 = vld [vmem:[%s2131_s8 + $0xa0] sm:$0xff]  ;;  %1146 = vmatpush.msra.mxu2 %v1042_v15  ;;  %v987_v7 = vld [vmem:[%s2131_s8 + $0x2e8] sm:$0xff]  ;;  %v896_v33 = vld [vmem:[%s2131_s8 + $0x10] sm:$0xff] }
 0x1ba   : > { %v978_v18 = vld [vmem:[%s2131_s8 + $0x2a0] sm:$0xff]  ;;  %1106 = vmatpush.msra.mxu0 %v914_v16  ;;  %1171 = vmatpush.msra.mxu3 %v895_v38  ;;  %v1055_v8 = vld [vmem:[%s2131_s8 + $0x508] sm:$0xff] }
 0x1bb   : > { %v1038_v19 = vld [vmem:[%s2131_s8 + $0x480] sm:$0xff]  ;;  %1126 = vmatpush.msra.mxu1 %v978_v18  ;;  %v983_v11 = vld [vmem:[%s2131_s8 + $0x2c8] sm:$0xff]  ;;  %v980_v18 = vld [vmem:[%s2131_s8 + $0x2b0] sm:$0xff] }
 0x1bc   : > { %v910_v20 = vld [vmem:[%s2131_s8 + $0x80] sm:$0xff]  ;;  %1147 = vmatpush.msra.mxu2 %v1038_v19  ;;  %1236 = vmatpush.msrb.mxu3 %v1020_v40  ;;  %v1051_v12 = vld [vmem:[%s2131_s8 + $0x4e8] sm:$0xff]  ;;  %v2277_v40 = vld [vmem:[#allocation2 + $0x10] sm:$0xff] }
 0x1bd   : > { %v974_v22 = vld [vmem:[%s2131_s8 + $0x280] sm:$0xff]  ;;  %1107 = vmatpush.msra.mxu0 %v910_v20  ;;  %v979_v15 = vld [vmem:[%s2131_s8 + $0x2a8] sm:$0xff]  ;;  %1172 = vmatmul.f32.vlgmr.msra.gmra.mxu3 %v2277_v40 }
 0x1be   : > { %v1034_v23 = vld [vmem:[%s2131_s8 + $0x460] sm:$0xff]  ;;  %1127 = vmatpush.msra.mxu1 %v974_v22  ;;  %1237 = vmatpush.msrb.mxu3 %v1016_v46  ;;  %v1047_v16 = vld [vmem:[%s2131_s8 + $0x4c8] sm:$0xff]  ;;  %v976_v22 = vld [vmem:[%s2131_s8 + $0x290] sm:$0xff] }
 0x1bf   : > { %v906_v24 = vld [vmem:[%s2131_s8 + $0x60] sm:$0xff]  ;;  %1148 = vmatpush.msra.mxu2 %v1034_v23  ;;  %v975_v19 = vld [vmem:[%s2131_s8 + $0x288] sm:$0xff] }
 0x1c0   : > { %v970_v26 = vld [vmem:[%s2131_s8 + $0x260] sm:$0xff]  ;;  %1108 = vmatpush.msra.mxu0 %v906_v24  ;;  %1238 = vmatpush.msrb.mxu3 %v1012_v50  ;;  %v1043_v20 = vld [vmem:[%s2131_s8 + $0x4a8] sm:$0xff]  ;;  %v1076_v50 = vld [vmem:[%s2131_s8 + $0x5b0] sm:$0xff] }
 0x1c1   : > { %v1030_v27 = vld [vmem:[%s2131_s8 + $0x440] sm:$0xff]  ;;  %1128 = vmatpush.msra.mxu1 %v970_v26  ;;  %v971_v23 = vld [vmem:[%s2131_s8 + $0x268] sm:$0xff]  ;;  %v972_v26 = vld [vmem:[%s2131_s8 + $0x270] sm:$0xff] }
 0x1c2   : > { %v902_v28 = vld [vmem:[%s2131_s8 + $0x40] sm:$0xff]  ;;  %1149 = vmatpush.msra.mxu2 %v1030_v27  ;;  %1239 = vmatpush.msrb.mxu3 %v1008_v54  ;;  %v1039_v24 = vld [vmem:[%s2131_s8 + $0x488] sm:$0xff]  ;;  %v1072_v54 = vld [vmem:[%s2131_s8 + $0x590] sm:$0xff] }
 0x1c3   : > { %v966_v30 = vld [vmem:[%s2131_s8 + $0x240] sm:$0xff]  ;;  %1109 = vmatpush.msra.mxu0 %v902_v28  ;;  %v967_v27 = vld [vmem:[%s2131_s8 + $0x248] sm:$0xff] }
 0x1c4   : > { %v1026_v31 = vld [vmem:[%s2131_s8 + $0x420] sm:$0xff]  ;;  %1129 = vmatpush.msra.mxu1 %v966_v30  ;;  %1240 = vmatpush.msrb.mxu3 %v1004_v58  ;;  %v1035_v28 = vld [vmem:[%s2131_s8 + $0x468] sm:$0xff]  ;;  %v968_v30 = vld [vmem:[%s2131_s8 + $0x250] sm:$0xff] }
 0x1c5   : > { %v898_v32 = vld [vmem:[%s2131_s8 + $0x20] sm:$0xff]  ;;  %1150 = vmatpush.msra.mxu2 %v1026_v31  ;;  %v963_v31 = vld [vmem:[%s2131_s8 + $0x228] sm:$0xff]  ;;  %v1001_v58 = vld [vmem:[%s2131_s8 + $0x358] sm:$0xff] }
 0x1c6   : > { %v962_v34 = vld [vmem:[%s2131_s8 + $0x220] sm:$0xff]  ;;  %1110 = vmatpush.msra.mxu0 %v898_v32  ;;  %1241 = vmatpush.msrb.mxu3 %v1000_v62  ;;  %v1031_v32 = vld [vmem:[%s2131_s8 + $0x448] sm:$0xff]  ;;  %v1064_v62 = vld [vmem:[%s2131_s8 + $0x550] sm:$0xff] }
 0x1c7   : > { %v1022_v35 = vld [vmem:[%s2131_s8 + $0x400] sm:$0xff]  ;;  %1130 = vmatpush.msra.mxu1 %v962_v34  ;;  %v964_v34 = vld [vmem:[%s2131_s8 + $0x230] sm:$0xff]  ;;  %v1027_v38 = vld [vmem:[%s2131_s8 + $0x428] sm:$0xff] }
 0x1c8   : > { %v894_v36 = vld [vmem:[%s2131_s8] sm:$0xff]  ;;  %1151 = vmatpush.msra.mxu2 %v1022_v35  ;;  %1242 = vmatpush.msrb.mxu3 %v996_v2  ;;  %v2271_v35 = vld [vmem:[#allocation2 + $0x8] sm:$0xff]  ;;  %v1060_v2 = vld [vmem:[%s2131_s8 + $0x530] sm:$0xff] }
 0x1c9   : > { %1111 = vmatpush.msra.mxu0 %v894_v36  ;;  %v958_v42 = vld [vmem:[%s2131_s8 + $0x200] sm:$0xff]  ;;  %v959_v36 = vld [vmem:[%s2131_s8 + $0x208] sm:$0xff]  ;;  %1152 = vmatmul.f32.vlgmr.msra.gmra.mxu2 %v2271_v35 }
 0x1ca   : > { %1216 = vmatpush.msrb.mxu2 %v956_v37  ;;  %1131 = vmatpush.msra.mxu1 %v958_v42  ;;  %v1021_v37 = vld [vmem:[%s2131_s8 + $0x3f8] sm:$0xff]  ;;  %v2287_v46 = vld [vmem:[#allocation2] sm:$0xff] }
 0x1cb   : > { %1176 = vmatpush.msrb.mxu0 %v1019_v39  ;;  %1243 = vmatpush.msrb.mxu3 %v992_v6  ;;  %v960_v39 = vld [vmem:[%s2131_s8 + $0x210] sm:$0xff]  ;;  %v1017_v42 = vld [vmem:[%s2131_s8 + $0x3d8] sm:$0xff] }
 0x1cc   : > { %1217 = vmatpush.msrb.mxu2 %v952_v41  ;;  %1196 = vmatpush.msrb.mxu1 %v1083_v44  ;;  %v1084_v41 = vld [vmem:[%s2131_s8 + $0x5f0] sm:$0xff]  ;;  %v1023_v44 = vld [vmem:[%s2131_s8 + $0x408] sm:$0xff] }
 0x1cd   : > { %1177 = vmatpush.msrb.mxu0 %v1015_v43  ;;  %1244 = vmatpush.msrb.mxu3 %v988_v10  ;;  %v1085_v43 = vld [vmem:[%s2131_s8 + $0x5f8] sm:$0xff]  ;;  %v1056_v6 = vld [vmem:[%s2131_s8 + $0x510] sm:$0xff] }
 0x1ce   : > { %1218 = vmatpush.msrb.mxu2 %v948_v45  ;;  %1197 = vmatpush.msrb.mxu1 %v1079_v48  ;;  %v1080_v45 = vld [vmem:[%s2131_s8 + $0x5d0] sm:$0xff]  ;;  %v957_v48 = vld [vmem:[%s2131_s8 + $0x1f8] sm:$0xff] }
 0x1cf   : > { %1178 = vmatpush.msrb.mxu0 %v1011_v47  ;;  %1245 = vmatpush.msrb.mxu3 %v984_v14  ;;  %v1013_v47 = vld [vmem:[%s2131_s8 + $0x3b8] sm:$0xff]  ;;  %v1052_v10 = vld [vmem:[%s2131_s8 + $0x4f0] sm:$0xff] }
 0x1d0   : > { %1219 = vmatpush.msrb.mxu2 %v944_v49  ;;  %1198 = vmatpush.msrb.mxu1 %v1075_v52  ;;  %v1081_v49 = vld [vmem:[%s2131_s8 + $0x5d8] sm:$0xff]  ;;  %v1048_v14 = vld [vmem:[%s2131_s8 + $0x4d0] sm:$0xff] }
 0x1d1   : > { %1179 = vmatpush.msrb.mxu0 %v1007_v51  ;;  %1246 = vmatpush.msrb.mxu3 %v980_v18  ;;  %v1009_v51 = vld [vmem:[%s2131_s8 + $0x398] sm:$0xff]  ;;  %v1044_v18 = vld [vmem:[%s2131_s8 + $0x4b0] sm:$0xff] }
 0x1d2   : > { %1220 = vmatpush.msrb.mxu2 %v940_v53  ;;  %1199 = vmatpush.msrb.mxu1 %v1071_v56  ;;  %v953_v52 = vld [vmem:[%s2131_s8 + $0x1d8] sm:$0xff] }
 0x1d3   : > { %1180 = vmatpush.msrb.mxu0 %v1003_v55  ;;  %1247 = vmatpush.msrb.mxu3 %v976_v22  ;;  %v1077_v53 = vld [vmem:[%s2131_s8 + $0x5b8] sm:$0xff]  ;;  %v1040_v22 = vld [vmem:[%s2131_s8 + $0x490] sm:$0xff] }
 0x1d4   : > { %1221 = vmatpush.msrb.mxu2 %v936_v57  ;;  %1200 = vmatpush.msrb.mxu1 %v1067_v60  ;;  %v1005_v55 = vld [vmem:[%s2131_s8 + $0x378] sm:$0xff] }
 0x1d5   : > { %1181 = vmatpush.msrb.mxu0 %v999_v59  ;;  %1248 = vmatpush.msrb.mxu3 %v972_v26  ;;  %v949_v56 = vld [vmem:[%s2131_s8 + $0x1b8] sm:$0xff]  ;;  %v1068_v59 = vld [vmem:[%s2131_s8 + $0x570] sm:$0xff] }
 0x1d6   : > { %1222 = vmatpush.msrb.mxu2 %v932_v61  ;;  %1201 = vmatpush.msrb.mxu1 %v1063_v0  ;;  %v1073_v57 = vld [vmem:[%s2131_s8 + $0x598] sm:$0xff]  ;;  %v1036_v26 = vld [vmem:[%s2131_s8 + $0x470] sm:$0xff] }
 0x1d7   : > { %1182 = vmatpush.msrb.mxu0 %v995_v63  ;;  %1249 = vmatpush.msrb.mxu3 %v968_v30  ;;  %v945_v60 = vld [vmem:[%s2131_s8 + $0x198] sm:$0xff]  ;;  %v1032_v30 = vld [vmem:[%s2131_s8 + $0x450] sm:$0xff] }
 0x1d8   : > { %1223 = vmatpush.msrb.mxu2 %v928_v1  ;;  %1202 = vmatpush.msrb.mxu1 %v1059_v4  ;;  %v1069_v61 = vld [vmem:[%s2131_s8 + $0x578] sm:$0xff] }
 0x1d9   : > { %1183 = vmatpush.msrb.mxu0 %v991_v3  ;;  %1250 = vmatpush.msrb.mxu3 %v964_v34  ;;  %v941_v63 = vld [vmem:[%s2131_s8 + $0x178] sm:$0xff]  ;;  %v1028_v34 = vld [vmem:[%s2131_s8 + $0x430] sm:$0xff] }
 0x1da   : > { %1224 = vmatpush.msrb.mxu2 %v924_v5  ;;  %1203 = vmatpush.msrb.mxu1 %v1055_v8  ;;  %v997_v0 = vld [vmem:[%s2131_s8 + $0x338] sm:$0xff] }
 0x1db   : > { %1184 = vmatpush.msrb.mxu0 %v987_v7  ;;  %1251 = vmatpush.msrb.mxu3 %v960_v39  ;;  %v1065_v1 = vld [vmem:[%s2131_s8 + $0x558] sm:$0xff]  ;;  %v1024_v39 = vld [vmem:[%s2131_s8 + $0x410] sm:$0xff] }
 0x1dc   : > { %1225 = vmatpush.msrb.mxu2 %v920_v9  ;;  %1204 = vmatpush.msrb.mxu1 %v1051_v12  ;;  %v937_v3 = vld [vmem:[%s2131_s8 + $0x158] sm:$0xff] }
 0x1dd   : > { %1185 = vmatpush.msrb.mxu0 %v983_v11  ;;  %1316 = vmatpush.msra.mxu3 %v1085_v43  ;;  %v993_v4 = vld [vmem:[%s2131_s8 + $0x318] sm:$0xff] }
 0x1de   : > { %1226 = vmatpush.msrb.mxu2 %v916_v13  ;;  %1205 = vmatpush.msrb.mxu1 %v1047_v16  ;;  %v1061_v5 = vld [vmem:[%s2131_s8 + $0x538] sm:$0xff] }
 0x1df   : > { %1186 = vmatpush.msrb.mxu0 %v979_v15  ;;  %1132 = vmatmul.f32.vlgmr.msra.gmra.mxu1 %v2287_v46  ;;  %v933_v7 = vld [vmem:[%s2131_s8 + $0x138] sm:$0xff] }
 0x1e0   : > { %1227 = vmatpush.msrb.mxu2 %v912_v17  ;;  %1206 = vmatpush.msrb.mxu1 %v1043_v20  ;;  %v989_v8 = vld [vmem:[%s2131_s8 + $0x2f8] sm:$0xff] }
 0x1e1   : > { %1187 = vmatpush.msrb.mxu0 %v975_v19  ;;  %1317 = vmatpush.msra.mxu3 %v1081_v49  ;;  %v1057_v9 = vld [vmem:[%s2131_s8 + $0x518] sm:$0xff] }
 0x1e2   : > { %1228 = vmatpush.msrb.mxu2 %v908_v21  ;;  %1207 = vmatpush.msrb.mxu1 %v1039_v24  ;;  %v929_v11 = vld [vmem:[%s2131_s8 + $0x118] sm:$0xff] }
 0x1e3   : > { %1188 = vmatpush.msrb.mxu0 %v971_v23  ;;  %1318 = vmatpush.msra.mxu3 %v1077_v53  ;;  %v985_v12 = vld [vmem:[%s2131_s8 + $0x2d8] sm:$0xff] }
 0x1e4   : > { %1229 = vmatpush.msrb.mxu2 %v904_v25  ;;  %1208 = vmatpush.msrb.mxu1 %v1035_v28  ;;  %v1053_v13 = vld [vmem:[%s2131_s8 + $0x4f8] sm:$0xff] }
 0x1e5   : > { %1189 = vmatpush.msrb.mxu0 %v967_v27  ;;  %1319 = vmatpush.msra.mxu3 %v1073_v57  ;;  %v925_v15 = vld [vmem:[%s2131_s8 + $0xf8] sm:$0xff] }
 0x1e6   : > { %1230 = vmatpush.msrb.mxu2 %v900_v29  ;;  %1209 = vmatpush.msrb.mxu1 %v1031_v32  ;;  %v981_v16 = vld [vmem:[%s2131_s8 + $0x2b8] sm:$0xff] }
 0x1e7   : > { %1190 = vmatpush.msrb.mxu0 %v963_v31  ;;  %1320 = vmatpush.msra.mxu3 %v1069_v61  ;;  %v1049_v17 = vld [vmem:[%s2131_s8 + $0x4d8] sm:$0xff] }
 0x1e8   : > { %1231 = vmatpush.msrb.mxu2 %v896_v33  ;;  %1210 = vmatpush.msrb.mxu1 %v1027_v38  ;;  %v921_v19 = vld [vmem:[%s2131_s8 + $0xd8] sm:$0xff] }
 0x1e9   : > { %1191 = vmatpush.msrb.mxu0 %v959_v36  ;;  %1321 = vmatpush.msra.mxu3 %v1065_v1  ;;  %v977_v20 = vld [vmem:[%s2131_s8 + $0x298] sm:$0xff] }
 0x1ea   : > { %1296 = vmatpush.msra.mxu2 %v1021_v37  ;;  %1112 = vmatmul.f32.vlgmr.msra.gmra.mxu0 %v2277_v40  ;;  %v1045_v21 = vld [vmem:[%s2131_s8 + $0x4b8] sm:$0xff] }
 0x1eb   : > { %1256 = vmatpush.msra.mxu0 %v1084_v41  ;;  %1211 = vmatpush.msrb.mxu1 %v1023_v44  ;;  %v917_v23 = vld [vmem:[%s2131_s8 + $0xb8] sm:$0xff]  ;;  %v1086_v44 = vld [vmem:[%s2139_s2] sm:$0xf] }
 0x1ec   : > { %1297 = vmatpush.msra.mxu2 %v1017_v42  ;;  %1212 = vmatmul.f32.vlgmr.msrb.gmra.mxu1 %v2271_v35  ;;  %v973_v24 = vld [vmem:[%s2131_s8 + $0x278] sm:$0xff] }
 0x1ed   : > { %1257 = vmatpush.msra.mxu0 %v1080_v45  ;;  %1276 = vmatpush.msra.mxu1 %v957_v48  ;;  %v1041_v25 = vld [vmem:[%s2131_s8 + $0x498] sm:$0xff]  ;;  %v1088_v45 = vperm.slane %v1086_v44, 0 }
 0x1ee   : > { %1298 = vmatpush.msra.mxu2 %v1013_v47  ;;  %1322 = vmatpush.msra.mxu3 %v1061_v5  ;;  %v913_v27 = vld [vmem:[%s2131_s8 + $0x98] sm:$0xff] }
 0x1ef   : > { %1258 = vmatpush.msra.mxu0 %v1076_v50  ;;  %1277 = vmatpush.msra.mxu1 %v953_v52  ;;  %v969_v28 = vld [vmem:[%s2131_s8 + $0x258] sm:$0xff] }
 0x1f0   : > { %1299 = vmatpush.msra.mxu2 %v1009_v51  ;;  %1323 = vmatpush.msra.mxu3 %v1057_v9  ;;  %v1037_v29 = vld [vmem:[%s2131_s8 + $0x478] sm:$0xff] }
 0x1f1   : > { %1259 = vmatpush.msra.mxu0 %v1072_v54  ;;  %1278 = vmatpush.msra.mxu1 %v949_v56  ;;  %v909_v31 = vld [vmem:[%s2131_s8 + $0x78] sm:$0xff] }
 0x1f2   : > { %1300 = vmatpush.msra.mxu2 %v1005_v55  ;;  %1192 = vmatmul.f32.vlgmr.msrb.gmra.mxu0 %v2287_v46  ;;  %v965_v32 = vld [vmem:[%s2131_s8 + $0x238] sm:$0xff] }
 0x1f3   : > { %1260 = vmatpush.msra.mxu0 %v1068_v59  ;;  %1279 = vmatpush.msra.mxu1 %v945_v60  ;;  %v1033_v33 = vld [vmem:[%s2131_s8 + $0x458] sm:$0xff] }
 0x1f4   : > { %1301 = vmatpush.msra.mxu2 %v1001_v58  ;;  %1324 = vmatpush.msra.mxu3 %v1053_v13  ;;  %v905_v36 = vld [vmem:[%s2131_s8 + $0x58] sm:$0xff] }
 0x1f5   : > { %1261 = vmatpush.msra.mxu0 %v1064_v62  ;;  %1280 = vmatpush.msra.mxu1 %v941_v63  ;;  %v961_v37 = vld [vmem:[%s2131_s8 + $0x218] sm:$0xff]  ;;  %v1091_v62 = vperm.slane %v1086_v44, 3 }
 0x1f6   : > { %1302 = vmatpush.msra.mxu2 %v997_v0  ;;  %1325 = vmatpush.msra.mxu3 %v1049_v17  ;;  %v1029_v38 = vld [vmem:[%s2131_s8 + $0x438] sm:$0xff] }
 0x1f7   : > { %1262 = vmatpush.msra.mxu0 %v1060_v2  ;;  %1281 = vmatpush.msra.mxu1 %v937_v3  ;;  %v901_v41 = vld [vmem:[%s2131_s8 + $0x38] sm:$0xff] }
 0x1f8   : > { %1303 = vmatpush.msra.mxu2 %v993_v4  ;;  %1326 = vmatpush.msra.mxu3 %v1045_v21  ;;  %v1025_v42 = vld [vmem:[%s2131_s8 + $0x418] sm:$0xff] }
 0x1f9   : > { %1263 = vmatpush.msra.mxu0 %v1056_v6  ;;  %1282 = vmatpush.msra.mxu1 %v933_v7  ;;  %v897_v43 = vld [vmem:[%s2131_s8 + $0x18] sm:$0xff] }
 0x1fa   : > { %1304 = vmatpush.msra.mxu2 %v989_v8  ;;  %1327 = vmatpush.msra.mxu3 %v1041_v25 }
 0x1fb   : > { %1264 = vmatpush.msra.mxu0 %v1052_v10  ;;  %1283 = vmatpush.msra.mxu1 %v929_v11 }
 0x1fc   : > { %1305 = vmatpush.msra.mxu2 %v985_v12  ;;  %1252 = vmatmul.f32.vlgmr.msrb.gmra.mxu3 %v2287_v46 }
 0x1fd   : > { %1265 = vmatpush.msra.mxu0 %v1048_v14  ;;  %1284 = vmatpush.msra.mxu1 %v925_v15 }
 0x1fe   : > { %1306 = vmatpush.msra.mxu2 %v981_v16  ;;  %1328 = vmatpush.msra.mxu3 %v1037_v29 }
 0x1ff   : > { %1266 = vmatpush.msra.mxu0 %v1044_v18  ;;  %1285 = vmatpush.msra.mxu1 %v921_v19 }
 0x200   : > { %1307 = vmatpush.msra.mxu2 %v977_v20  ;;  %1329 = vmatpush.msra.mxu3 %v1033_v33 }
 0x201   : > { %1232 = vmatmul.f32.vlgmr.msrb.gmra.mxu2 %v2277_v40  ;;  %1267 = vmatpush.msra.mxu0 %v1040_v22 }
 0x202   : > { %1286 = vmatpush.msra.mxu1 %v917_v23  ;;  %1308 = vmatpush.msra.mxu2 %v973_v24 }
 0x203   : > { %1268 = vmatpush.msra.mxu0 %v1036_v26  ;;  %1330 = vmatpush.msra.mxu3 %v1029_v38 }
 0x204   : > { %1287 = vmatpush.msra.mxu1 %v913_v27  ;;  %1309 = vmatpush.msra.mxu2 %v969_v28 }
 0x205   : > { %1269 = vmatpush.msra.mxu0 %v1032_v30  ;;  %1331 = vmatpush.msra.mxu3 %v1025_v42 }
 0x206   : > { %1288 = vmatpush.msra.mxu1 %v909_v31  ;;  %1310 = vmatpush.msra.mxu2 %v965_v32 }
 0x207   : > { %1270 = vmatpush.msra.mxu0 %v1028_v34  ;;  %1332 = vmatmul.f32.vlgmr.msra.gmra.mxu3 %v2271_v35 }
 0x208   : > { %1289 = vmatpush.msra.mxu1 %v905_v36  ;;  %1311 = vmatpush.msra.mxu2 %v961_v37 }
 0x209   : > { %1312 = vmatmul.f32.vlgmr.msra.gmra.mxu2 %v2287_v46  ;;  %1271 = vmatpush.msra.mxu0 %v1024_v39  ;;  %v1089_v46 = vperm.slane %v1086_v44, 1 }
 0x20a   : > { %1290 = vmatpush.msra.mxu1 %v901_v41  ;;  %1272 = vmatmul.f32.vlgmr.msra.gmra.mxu0 %v2271_v35 }
 0x20c   : > { %1291 = vmatpush.msra.mxu1 %v897_v43 }
 0x20d   : > { %1292 = vmatmul.f32.vlgmr.msra.gmra.mxu1 %v2277_v40  ;;  %v1090_v40 = vperm.slane %v1086_v44, 2 }
 0x240   : > { %v1173_v53 = vpop.f32.mrf.mxu3 }
 0x241   : > { %v1174_v54 = vadd.f32 %v1173_v53, %v1089_v46 }
 0x24c   : > { %v1153_v50 = vpop.f32.mrf.mxu2 }
 0x25c   : > { %v1133_v49 = vpop.f32.mrf.mxu1 }
 0x267   : > { %v1113_v47 = vpop.f32.mrf.mxu0 }
 0x268   : > { %v1114_v48 = vadd.f32 %v1113_v47, %v1088_v45 }
 0x269   : > { %v1213_v56 = vpop.f32.mrf.mxu1 }
 0x26a   : > { %v1134_v51 = vadd.f32 %v1133_v49, %v1114_v48 }
 0x26c   : > { %v1154_v52 = vadd.f32 %v1153_v50, %v1134_v51 }
 0x26e   : > { %1336 = vst [vmem:[%s2141_s21] sm:$0xff] %v1154_v52 }
 0x26f   : > { %v1193_v55 = vpop.f32.mrf.mxu0 }
 0x270   : > { %v1194_v35 = vadd.f32 %v1193_v55, %v1174_v54 }
 0x272   : > { %v1214_v57 = vadd.f32 %v1213_v56, %v1194_v35 }
 0x274   : > { %1337 = vst [vmem:[%s2141_s21 + $0x8] sm:$0xff] %v1214_v57 }
 0x27f   : > { %v1253_v60 = vpop.f32.mrf.mxu3 }
 0x284   : > { %v1233_v58 = vpop.f32.mrf.mxu2 }
 0x285   : > { %v1234_v59 = vadd.f32 %v1233_v58, %v1090_v40 }
 0x287   : > { %v1254_v61 = vadd.f32 %v1253_v60, %v1234_v59  ;;  %v1273_v63 = vpop.f32.mrf.mxu0 }
 0x289   : > { %v1274_v0 = vadd.f32 %v1273_v63, %v1254_v61 }
 0x28a   : > { %v1293_v1 = vpop.f32.mrf.mxu1  ;;  %v1333_v5 = vpop.f32.mrf.mxu3 }
 0x28b   : > { %1338 = vst [vmem:[%s2141_s21 + $0x10] sm:$0xff] %v1274_v0  ;;  %v1294_v2 = vadd.f32 %v1293_v1, %v1091_v62 }
 0x28c   : > { %v1313_v3 = vpop.f32.mrf.mxu2 }
 0x28d   : > { %v1314_v4 = vadd.f32 %v1313_v3, %v1294_v2 }
 0x28f   : > { %v1334_v6 = vadd.f32 %v1333_v5, %v1314_v4 }
 0x291   : > { %1339 = vst [vmem:[%s2141_s21 + $0x18] sm:$0xff] %v1334_v6 }
 0x292   : > { %1863 = shalt.err (!%p1860_p0)
}
 0x293   : > { %1563 = dma.vmem_to_hbm [thread:$0]  (%p2033_p8), %s1357_s13, 512, %s1359_s19, %s1341_s27  }
 0x294 PF: > { %s2442_s29 = sld [smem:[#allocation20_spill]] }
 0x295   : > { %s2443_s16 = sld [smem:[#allocation19_spill]] }
 0x29a   : > { %p1598_p1 = scmp.ge.s32.totalorder %s2442_s29, 2 }
 0x29b   : > { %s1370_s21 = sand.u32 1, %s2443_s16  }
 0x29c   : > { %p1586_p2 = pnand %p1598_p1, %p2037_p9  ;;  %s1371_s30 = scalar_lea.sflag [#allocation5], %s1370_s21 }
 0x29e   : > { %p1587_p4 = pneg %p1586_p2 }
 0x2a0   : > { %1905 = dma.done.wait (%p1587_p4), %s1371_s30, 512  }
 0x2a1   : > { %1907 = vsyncadd (%p1587_p4), %s1371_s30, 4294966784  ;;  %s23_s29 = sadd.s32 1, %s2442_s29   ;;  %s2445_s11 = smov %s2089_s24 }
 0x2a2   : > { %p20_p5 = scmp.ge.s32.totalorder %s23_s29, 11   ;;  %s2446_s24 = smov %s1914_s25 }
 0x2a3   : > { %s2447_s25 = smov %s1918_s26  ;;  %s2448_s26 = smov %s2445_s11 }
 0x2a4   : > { %s2449_s27 = smov %s1926_s28  ;;  %s2450_s28 = smov %s2452_s10 }
 0x2a5   :  { %22 = sbr.rel (!%p20_p5) target bundleno = 13 (0xd), region = 126 }
 0x2aa   :  { %1377 = vsyncpa [#allocation4], 1 }
 0x2ab   :  { %1379 = vsyncpa [#allocation4 + $0x1], 1 }
 0x2ac   :  { %1380 = vsyncpa [#allocation7], 1 }
 0x2ad   :  { %1381 = vsyncpa [#allocation10], 1 }
 0x2ae   :  { %1382 = vsyncpa [#allocation5], 1 }
 0x2af   :  { %1384 = vsyncpa [#allocation5 + $0x1], 1 }

</bundles_post_ra>
